<compile_context>
chip_gen: v5e
topology: v5e:2x2
jax: 0.10.0
libtpu: 0.0.40
codegen_flags: <defaults>
</compile_context>

<pallas_src>
import jax
import jax.numpy as jnp
from jax.experimental import pallas as pl
from jax.experimental.pallas import tpu as pltpu

_EPS = 1e-5  # torch.nn.LayerNorm default eps


def _prenorm_linear_kernel(x_ref, gamma_ref, beta_ref, wt_ref, wsum_ref,
                           pbias_ref, o_ref):
    # x_ref block: [Bb, HW, C]; gamma/beta: [1, HW, 1]; wt: [C_in, C_out];
    # wsum: [1, 1, C_out] (row-sums of W); pbias: [1, 1, C_out].
    x = x_ref[...].astype(jnp.float32)                       # [Bb, HW, C]

    # Two-pass LayerNorm statistics over the HW axis, per (b, c).
    mean = jnp.mean(x, axis=1, keepdims=True)                # [Bb, 1, C]
    xc = x - mean
    var = jnp.mean(xc * xc, axis=1, keepdims=True)           # [Bb, 1, C]
    inv = jax.lax.rsqrt(var + _EPS)

    # LN scale; beta is folded into the rank-1 output bias below, so the MXU
    # operand is just (x - mean) * inv * gamma, cast to the MXU dtype.
    xg = (xc * inv * gamma_ref[...]).astype(wt_ref.dtype)    # [Bb, HW, C]

    bb, hw, c = xg.shape
    # Leading-dim merge is layout-free (HW is sublane-tile aligned; asserted in
    # the wrapper), so this is one fused [Bb*HW, C] x [C, C] MXU matmul.
    out = jnp.dot(xg.reshape(bb * hw, c), wt_ref[...],
                  preferred_element_type=jnp.float32)        # [Bb*HW, C]
    out = out.reshape(bb, hw, -1)                            # [Bb, HW, C]

    # Rank-1 effective bias formed in-registers (VPU slack; no [HW,C] operand):
    #   (xn*g + beta) @ W^T + b  ==  (xn*g) @ W^T + beta[hw]*rowsum(W)[o] + b[o]
    out = out + beta_ref[...] * wsum_ref[...] + pbias_ref[...]
    o_ref[...] = out.astype(o_ref.dtype)


def _round_up(v, m):
    return ((v + m - 1) // m) * m


def _padded_block_bytes(HW, C, itemsize):
    """VMEM bytes of one batch row of an x/out block, including the (sublane,
    128-lane) padding that applies when C < 128."""
    sub = 8 * max(1, 4 // itemsize)           # 8 for f32, 16 for bf16
    return _round_up(HW, sub) * _round_up(C, 128) * itemsize


def _tpu_params():
    """(num_tensorcores_to_feed, vmem_budget_bytes), gated by TPU generation."""
    kind = ""
    try:
        kind = jax.devices()[0].device_kind.lower()
    except Exception:
        pass
    if "7" in kind:                            # v7x: 2 TCs/chip, 64 MiB VMEM/TC
        num_tc, budget = 2, 44 << 20
    elif "v6" in kind or "v5 lite" in kind or "v5e" in kind or "v5lite" in kind:
        num_tc, budget = 1, 96 << 20           # single TC, 128 MiB physical
    else:                                      # unknown: conservative, safe
        num_tc, budget = 1, 32 << 20
    try:
        phys = pltpu.get_tpu_info().vmem_capacity_bytes
        budget = min(budget, int(phys * 3 // 4))
    except Exception:
        pass
    return num_tc, budget


def _choose_block_batch(B, per_batch_bytes, *, num_tc, vmem_budget,
                        target_block_bytes=8 << 20):
    """Largest divisor of B such that:
      * one (padded) x block stays <= ~target_block_bytes,
      * the double-buffered in+out footprint fits ~3/4 of the VMEM budget,
      * on multi-TC chips (v7x) the grid keeps >= num_tc steps and, when
        possible, a step count that is a multiple of num_tc (balanced cores)."""
    cap = max(1, target_block_bytes // per_batch_bytes)
    cap = min(cap, max(1, (vmem_budget * 3 // 4) // (4 * per_batch_bytes)))
    if num_tc > 1 and B > 1:
        cap = min(cap, max(1, B // num_tc))
    divisors = [d for d in range(1, B + 1) if B % d == 0]
    feasible = [d for d in divisors if d <= cap] or [1]
    best = max(feasible)
    if num_tc > 1:
        balanced = [d for d in feasible if (B // d) % num_tc == 0]
        if balanced:
            best = max(balanced)
    return best


def prenorm_linear(x, ln_weight, ln_bias, proj_weight, proj_bias,
                   *, block_b=None, mxu_dtype=None):
    """x: [B, HW, C]; ln_weight/ln_bias: [HW]; proj_weight: [C, C] (out, in);
    proj_bias: [C].  Returns fn(LayerNorm(x)) with fn = Linear, shape [B, HW, C]."""
    B, HW, C = x.shape
    itemsize = x.dtype.itemsize
    assert HW % 8 == 0, (
        "HW must be a multiple of 8 so the in-kernel [Bb,HW,C]<->[Bb*HW,C] "
        "reshape is a layout-free leading-dim merge.")

    num_tc, vmem_budget = _tpu_params()
    per_batch = _padded_block_bytes(HW, C, itemsize)
    if 4 * per_batch + (2 << 20) > vmem_budget:
        # TODO(synk): tile the HW axis (two-pass LN: stats grid pass, then
        # normalize+project) for huge per-batch blocks (e.g. B==1, big HW*C).
        raise ValueError("A single batch row does not fit the VMEM budget; "
                         "HW-axis tiling not implemented.")

    if mxu_dtype is None:
        # bf16 MXU operands when activations are bf16 (and the bf16 sublane
        # tile of 16 divides HW); f32 otherwise for tight accuracy.
        mxu_dtype = (jnp.bfloat16
                     if (x.dtype == jnp.bfloat16 and HW % 16 == 0)
                     else jnp.float32)
    if block_b is None:
        block_b = _choose_block_batch(B, per_batch, num_tc=num_tc,
                                      vmem_budget=vmem_budget)
    assert B % block_b == 0
    grid_b = B // block_b

    gamma = ln_weight.reshape(1, HW, 1).astype(jnp.float32)
    beta = ln_bias.reshape(1, HW, 1).astype(jnp.float32)
    wt = proj_weight.T.astype(mxu_dtype)                       # [C_in, C_out]
    wsum = jnp.sum(proj_weight.astype(jnp.float32), axis=1).reshape(1, 1, C)
    pbias = proj_bias.astype(jnp.float32).reshape(1, 1, C)

    cost = pl.CostEstimate(
        flops=2 * B * HW * C * C + 10 * B * HW * C,
        transcendentals=B * C,                                 # rsqrt per (b, c)
        bytes_accessed=(2 * B * HW * C * itemsize              # x in + out
                        + C * C * jnp.dtype(mxu_dtype).itemsize
                        + (2 * HW + 2 * C) * 4))

    return pl.pallas_call(
        _prenorm_linear_kernel,
        out_shape=jax.ShapeDtypeStruct((B, HW, C), x.dtype),
        grid_spec=pltpu.PrefetchScalarGridSpec(
            num_scalar_prefetch=0,
            grid=(grid_b,),
            in_specs=[
                pl.BlockSpec((block_b, HW, C), lambda b: (b, 0, 0)),  # x
                pl.BlockSpec((1, HW, 1), lambda b: (0, 0, 0)),        # LN gamma
                pl.BlockSpec((1, HW, 1), lambda b: (0, 0, 0)),        # LN beta
                pl.BlockSpec((C, C), lambda b: (0, 0)),               # proj W^T
                pl.BlockSpec((1, 1, C), lambda b: (0, 0, 0)),         # rowsum(W)
                pl.BlockSpec((1, 1, C), lambda b: (0, 0, 0)),         # proj bias
            ],
            out_specs=pl.BlockSpec((block_b, HW, C), lambda b: (b, 0, 0)),
        ),
        compiler_params=pltpu.CompilerParams(
            dimension_semantics=("parallel",),
            vmem_limit_bytes=int(vmem_budget),
        ),
        cost_estimate=cost,
    )(x, gamma, beta, wt, wsum, pbias)


def _reference(x, ln_weight, ln_bias, proj_weight, proj_bias):
    # Pure-JAX (f32) reference mirroring the PyTorch forward.
    xf = x.astype(jnp.float32)
    mean = jnp.mean(xf, axis=1, keepdims=True)                       # over hw
    var = jnp.mean((xf - mean) ** 2, axis=1, keepdims=True)
    xn = (xf - mean) / jnp.sqrt(var + _EPS)
    xn = (xn * ln_weight.astype(jnp.float32)[None, :, None]
          + ln_bias.astype(jnp.float32)[None, :, None])
    return (jnp.einsum("bhc,oc->bho", xn, proj_weight.astype(jnp.float32))
            + proj_bias.astype(jnp.float32)[None, None, :])


if __name__ == "__main__":
    # Small shapes consistent with the module: B = nW*batch, HW = window^2, C = dim.
    B, HW, C = 8, 64, 32

    key = jax.random.PRNGKey(0)
    k1, k2, k3, k4, k5, k6 = jax.random.split(key, 6)
    x = jax.random.normal(k1, (B, HW, C), dtype=jnp.float32)
    ln_weight = 1.0 + 0.1 * jax.random.normal(k2, (HW,), dtype=jnp.float32)
    ln_bias = 0.1 * jax.random.normal(k3, (HW,), dtype=jnp.float32)
    proj_weight = jax.random.normal(k4, (C, C), dtype=jnp.float32) / jnp.sqrt(C)
    proj_bias = 0.1 * jax.random.normal(k5, (C,), dtype=jnp.float32)

    # f32 path (f32 MXU operands; tight tolerance vs f32 reference).
    out = jax.block_until_ready(
        prenorm_linear(x, ln_weight, ln_bias, proj_weight, proj_bias))
    ref = _reference(x, ln_weight, ln_bias, proj_weight, proj_bias)
    assert out.shape == (B, HW, C)
    assert jnp.allclose(out, ref, atol=1e-4, rtol=1e-4), "f32 mismatch vs reference"

    # Non-zero-mean activations (exercises the two-pass LN statistics path).
    x_off = x + 10.0 * jax.random.normal(k6, (B, 1, C), dtype=jnp.float32)
    out_off = jax.block_until_ready(
        prenorm_linear(x_off, ln_weight, ln_bias, proj_weight, proj_bias))
    ref_off = _reference(x_off, ln_weight, ln_bias, proj_weight, proj_bias)
    assert jnp.allclose(out_off, ref_off, atol=1e-3, rtol=1e-3), \
        "f32 (non-zero-mean) mismatch vs reference"

    # bf16 path (bf16 activations & weights on the MXU, f32 stats/accumulate).
    # Note: this rounds xn*gamma to bf16 before the matmul, so it differs
    # slightly from a PyTorch bf16 LayerNorm+Linear that keeps the full bf16 LN
    # output; tolerances reflect that.
    x_bf16 = x.astype(jnp.bfloat16)
    out_bf16 = jax.block_until_ready(
        prenorm_linear(x_bf16, ln_weight, ln_bias, proj_weight, proj_bias))
    ref_bf16 = _reference(x_bf16, ln_weight, ln_bias, proj_weight, proj_bias)
    assert out_bf16.dtype == jnp.bfloat16
    assert jnp.allclose(out_bf16.astype(jnp.float32), ref_bf16,
                        atol=5e-2, rtol=5e-2), "bf16 mismatch vs reference"

    print("KERNEL_OK")
</pallas_src>

<mosaic_0001>
module attributes {stable_mosaic.version = 11 : i64} {
  func.func @_prenorm_linear_kernel(%arg0: i32, %arg1: memref<8x64x32xf32, #tpu.memory_space<vmem>>, %arg2: memref<1x64x1xf32, #tpu.memory_space<vmem>>, %arg3: memref<1x64x1xf32, #tpu.memory_space<vmem>>, %arg4: memref<32x32xf32, #tpu.memory_space<vmem>>, %arg5: memref<1x1x32xf32, #tpu.memory_space<vmem>>, %arg6: memref<1x1x32xf32, #tpu.memory_space<vmem>>, %arg7: memref<8x64x32xf32, #tpu.memory_space<vmem>>) attributes {dimension_semantics = [#tpu.dimension_semantics<parallel>], iteration_bounds = array<i64: 1>, scalar_prefetch = 0 : i64, scratch_operands = 0 : i64, tpu.core_type = #tpu.core_type<tc>, window_params = [{transform_indices = @transform_0, window_bounds = array<i64: 8, 64, 32>}, {pipeline_mode = #tpu.pipeline_mode<synchronous>, transform_indices = @transform_1, window_bounds = array<i64: 1, 64, 1>}, {pipeline_mode = #tpu.pipeline_mode<synchronous>, transform_indices = @transform_2, window_bounds = array<i64: 1, 64, 1>}, {pipeline_mode = #tpu.pipeline_mode<synchronous>, transform_indices = @transform_3, window_bounds = array<i64: 32, 32>}, {pipeline_mode = #tpu.pipeline_mode<synchronous>, transform_indices = @transform_4, window_bounds = array<i64: 1, 1, 32>}, {pipeline_mode = #tpu.pipeline_mode<synchronous>, transform_indices = @transform_5, window_bounds = array<i64: 1, 1, 32>}, {transform_indices = @transform_6, window_bounds = array<i64: 8, 64, 32>}]} {
    %c0 = arith.constant 0 : index
    %c0_0 = arith.constant 0 : index
    %c0_1 = arith.constant 0 : index
    %0 = vector.load %arg1[%c0, %c0_0, %c0_1] : memref<8x64x32xf32, #tpu.memory_space<vmem>>, vector<8x64x32xf32>
    %cst = arith.constant dense<0.000000e+00> : vector<8x32xf32>
    %1 = vector.multi_reduction <add>, %0, %cst [1] : vector<8x64x32xf32> to vector<8x32xf32>
    %2 = vector.shape_cast %1 : vector<8x32xf32> to vector<8x1x32xf32>
    %cst_2 = arith.constant 6.400000e+01 : f32
    %3 = vector.broadcast %cst_2 : f32 to vector<8x1x32xf32>
    %4 = arith.divf %2, %3 : vector<8x1x32xf32>
    %5 = vector.broadcast %4 : vector<8x1x32xf32> to vector<8x64x32xf32>
    %6 = arith.subf %0, %5 : vector<8x64x32xf32>
    %7 = arith.mulf %6, %6 : vector<8x64x32xf32>
    %cst_3 = arith.constant dense<0.000000e+00> : vector<8x32xf32>
    %8 = vector.multi_reduction <add>, %7, %cst_3 [1] : vector<8x64x32xf32> to vector<8x32xf32>
    %9 = vector.shape_cast %8 : vector<8x32xf32> to vector<8x1x32xf32>
    %cst_4 = arith.constant 6.400000e+01 : f32
    %10 = vector.broadcast %cst_4 : f32 to vector<8x1x32xf32>
    %11 = arith.divf %9, %10 : vector<8x1x32xf32>
    %cst_5 = arith.constant 9.99999974E-6 : f32
    %12 = vector.broadcast %cst_5 : f32 to vector<8x1x32xf32>
    %13 = arith.addf %11, %12 : vector<8x1x32xf32>
    %14 = math.rsqrt %13 : vector<8x1x32xf32>
    %15 = vector.broadcast %14 : vector<8x1x32xf32> to vector<8x64x32xf32>
    %16 = arith.mulf %6, %15 : vector<8x64x32xf32>
    %c0_6 = arith.constant 0 : index
    %c0_7 = arith.constant 0 : index
    %c0_8 = arith.constant 0 : index
    %17 = vector.load %arg2[%c0_6, %c0_7, %c0_8] : memref<1x64x1xf32, #tpu.memory_space<vmem>>, vector<1x64x1xf32>
    %18 = vector.broadcast %17 : vector<1x64x1xf32> to vector<8x64x32xf32>
    %19 = arith.mulf %16, %18 : vector<8x64x32xf32>
    %20 = vector.shape_cast %19 : vector<8x64x32xf32> to vector<512x32xf32>
    %c0_9 = arith.constant 0 : index
    %c0_10 = arith.constant 0 : index
    %21 = vector.load %arg4[%c0_9, %c0_10] : memref<32x32xf32, #tpu.memory_space<vmem>>, vector<32x32xf32>
    %cst_11 = arith.constant dense<0.000000e+00> : vector<512x32xf32>
    %22 = tpu.matmul %20, %21, %cst_11 {dimension_numbers = #tpu.dot_dimension_numbers<[1], [0], [0], [1], [0, 0, 1, 1], [], []>} : vector<512x32xf32>, vector<32x32xf32>, vector<512x32xf32> -> vector<512x32xf32>
    %23 = vector.shape_cast %22 : vector<512x32xf32> to vector<8x64x32xf32>
    %c0_12 = arith.constant 0 : index
    %c0_13 = arith.constant 0 : index
    %c0_14 = arith.constant 0 : index
    %24 = vector.load %arg3[%c0_12, %c0_13, %c0_14] : memref<1x64x1xf32, #tpu.memory_space<vmem>>, vector<1x64x1xf32>
    %c0_15 = arith.constant 0 : index
    %c0_16 = arith.constant 0 : index
    %c0_17 = arith.constant 0 : index
    %25 = vector.load %arg5[%c0_15, %c0_16, %c0_17] : memref<1x1x32xf32, #tpu.memory_space<vmem>>, vector<1x1x32xf32>
    %26 = vector.broadcast %24 : vector<1x64x1xf32> to vector<1x64x32xf32>
    %27 = vector.broadcast %25 : vector<1x1x32xf32> to vector<1x64x32xf32>
    %28 = arith.mulf %26, %27 : vector<1x64x32xf32>
    %29 = vector.broadcast %28 : vector<1x64x32xf32> to vector<8x64x32xf32>
    %30 = arith.addf %23, %29 : vector<8x64x32xf32>
    %c0_18 = arith.constant 0 : index
    %c0_19 = arith.constant 0 : index
    %c0_20 = arith.constant 0 : index
    %31 = vector.load %arg6[%c0_18, %c0_19, %c0_20] : memref<1x1x32xf32, #tpu.memory_space<vmem>>, vector<1x1x32xf32>
    %32 = vector.broadcast %31 : vector<1x1x32xf32> to vector<8x64x32xf32>
    %33 = arith.addf %30, %32 : vector<8x64x32xf32>
    %c0_21 = arith.constant 0 : index
    %c0_22 = arith.constant 0 : index
    %c0_23 = arith.constant 0 : index
    %34 = vector.load %arg7[%c0_21, %c0_22, %c0_23] : memref<8x64x32xf32, #tpu.memory_space<vmem>>, vector<8x64x32xf32>
    tpu.vector_store %arg7[%c0_21, %c0_22, %c0_23], %33 {strides = array<i32>} : memref<8x64x32xf32, #tpu.memory_space<vmem>>, vector<8x64x32xf32>,
    return
  }
  func.func @transform_0(%arg0: i32) -> (i32, i32, i32) {
    %c0_i32 = arith.constant 0 : i32
    %c0_i32_0 = arith.constant 0 : i32
    %c0_i32_1 = arith.constant 0 : i32
    return %arg0, %c0_i32, %c0_i32_0 : i32, i32, i32
  }
  func.func @transform_1(%arg0: i32) -> (i32, i32, i32) {
    %c0_i32 = arith.constant 0 : i32
    %c0_i32_0 = arith.constant 0 : i32
    %c0_i32_1 = arith.constant 0 : i32
    %c0_i32_2 = arith.constant 0 : i32
    return %c0_i32, %c0_i32_0, %c0_i32_1 : i32, i32, i32
  }
  func.func @transform_2(%arg0: i32) -> (i32, i32, i32) {
    %c0_i32 = arith.constant 0 : i32
    %c0_i32_0 = arith.constant 0 : i32
    %c0_i32_1 = arith.constant 0 : i32
    %c0_i32_2 = arith.constant 0 : i32
    return %c0_i32, %c0_i32_0, %c0_i32_1 : i32, i32, i32
  }
  func.func @transform_3(%arg0: i32) -> (i32, i32) {
    %c0_i32 = arith.constant 0 : i32
    %c0_i32_0 = arith.constant 0 : i32
    %c0_i32_1 = arith.constant 0 : i32
    return %c0_i32, %c0_i32_0 : i32, i32
  }
  func.func @transform_4(%arg0: i32) -> (i32, i32, i32) {
    %c0_i32 = arith.constant 0 : i32
    %c0_i32_0 = arith.constant 0 : i32
    %c0_i32_1 = arith.constant 0 : i32
    %c0_i32_2 = arith.constant 0 : i32
    return %c0_i32, %c0_i32_0, %c0_i32_1 : i32, i32, i32
  }
  func.func @transform_5(%arg0: i32) -> (i32, i32, i32) {
    %c0_i32 = arith.constant 0 : i32
    %c0_i32_0 = arith.constant 0 : i32
    %c0_i32_1 = arith.constant 0 : i32
    %c0_i32_2 = arith.constant 0 : i32
    return %c0_i32, %c0_i32_0, %c0_i32_1 : i32, i32, i32
  }
  func.func @transform_6(%arg0: i32) -> (i32, i32, i32) {
    %c0_i32 = arith.constant 0 : i32
    %c0_i32_0 = arith.constant 0 : i32
    %c0_i32_1 = arith.constant 0 : i32
    return %arg0, %c0_i32, %c0_i32_0 : i32, i32, i32
  }
}

</mosaic_0001>

<bundles_post_ra>
// kernel: tpu_custom_call.1
= control target key start
LH: loop header
LB: loop body
LE: loop exit
PB: predicated region body
PF: predicated region fallthrough
CT: control target
= control target key end

     0   :  { %v1605_v0 = vmov 0   ;;  %vm87_vm0 = vcmask 261120   ;;  %v1606_v39 = vmov 64.0   ;;  %s3342_s1 = inlined_call_operand.vmem [shape: f32[1,64,1], index: 1, kind: input, shape index: {}]   ;;  %s3343_s0 = inlined_call_operand.vmem [shape: f32[8,64,32], index: 0, kind: input, shape index: {}]   ;;  %s3344_s3 = inlined_call_operand.vmem [shape: f32[32,32], index: 3, kind: input, shape index: {}]   ;;  %s3345_s2 = inlined_call_operand.vmem [shape: f32[1,64,1], index: 2, kind: input, shape index: {}]   ;;  %s3346_s4 = inlined_call_operand.vmem [shape: f32[1,1,32], index: 4, kind: input, shape index: {}]   ;;  %s3347_s5 = inlined_call_operand.vmem [shape: f32[1,1,32], index: 5, kind: input, shape index: {}]   ;;  %s3348_s6 = inlined_call_operand.vmem [shape: f32[8,64,32], index: 6, kind: output, shape index: {}]  }
   0x1   :  { %1583 = vset.pattern.permute.xlu1 %v1605_v0  ;;  %1582 = vset.pattern.permute.xlu0 %v1605_v0  ;;  %v729_v1 = vld [vmem:[%s3342_s1 + $0x10] sm:$0xff]  ;;  %v727_v2 = vld [vmem:[%s3342_s1] sm:$0xff]  ;;  %v730_v4 = vld [vmem:[%s3342_s1 + $0x18] sm:$0xff]  ;;  %1587 = vrcp.f32 %v1606_v39 }
   0x2   :  { %747 = vperm.xlu1 %1583, %v729_v1   ;;  %737 = vperm.xlu0 %1582, %v727_v2   ;;  %v731_v3 = vld [vmem:[%s3342_s1 + $0x20] sm:$0xff]  ;;  %v1662_v6 = vld [vmem:[%s3343_s0 + $0x8] sm:$0xff]  ;;  %v1667_v7 = vld [vmem:[%s3343_s0 + $0x10] sm:$0xff] }
   0x3   :  { %1584 = vset.pattern.permute.xlu2 %v1605_v0  ;;  %v1657_v5 = vld [vmem:[%s3343_s0] sm:$0xff]  ;;  %v1672_v8 = vld [vmem:[%s3343_s0 + $0x18] sm:$0xff]  ;;  %v728_v10 = vld [vmem:[%s3342_s1 + $0x8] sm:$0xff]  ;;  %v89_v11 = vsel %vm87_vm0, %v1662_v6, 0.0  ;;  %v91_v12 = vsel %vm87_vm0, %v1667_v7, 0.0 }
   0x4   :  { %757 = vperm.xlu2 %1584, %v731_v3   ;;  %v88_v9 = vsel %vm87_vm0, %v1657_v5, 0.0  ;;  %v1686_v13 = vld [vmem:[%s3343_s0 + $0x80] sm:$0xff]  ;;  %v1691_v14 = vld [vmem:[%s3343_s0 + $0x88] sm:$0xff]  ;;  %v1701_v17 = vld [vmem:[%s3343_s0 + $0x90] sm:$0xff]  ;;  %v93_v22 = vsel %vm87_vm0, %v1672_v8, 0.0 }
   0x5   :  { %v1696_v15 = vld [vmem:[%s3343_s0 + $0x20] sm:$0xff]  ;;  %v90_v16 = vadd.f32 %v89_v11, %v88_v9  ;;  %v1706_v18 = vld [vmem:[%s3343_s0 + $0x98] sm:$0xff]  ;;  %v130_v19 = vsel %vm87_vm0, %v1686_v13, 0.0  ;;  %v131_v20 = vsel %vm87_vm0, %v1691_v14, 0.0  ;;  %v732_v21 = vld [vmem:[%s3342_s1 + $0x28] sm:$0xff]  ;;  %v133_v25 = vsel %vm87_vm0, %v1701_v17, 0.0 }
   0x6   :  { %v1720_v23 = vld [vmem:[%s3343_s0 + $0xa0] sm:$0xff]  ;;  %v132_v24 = vadd.f32 %v131_v20, %v130_v19  ;;  %v842_v27 = vld [vmem:[%s3344_s3 + $0x18] sm:$0xff]  ;;  %v1735_v28 = vld [vmem:[%s3343_s0 + $0x28] sm:$0xff]  ;;  %v135_v31 = vsel %vm87_vm0, %v1706_v18, 0.0  ;;  %v95_v35 = vsel %vm87_vm0, %v1696_v15, 0.0 }
   0x7   :  { %v1727_v26 = vld [vmem:[%s3343_s0 + $0x100] sm:$0xff]  ;;  %v92_v29 = vadd.f32 %v91_v12, %v90_v16  ;;  %v1740_v30 = vld [vmem:[%s3343_s0 + $0xa8] sm:$0xff]  ;;  %1047 = vmatpush.msra.mxu0 %v842_v27  ;;  %1568 = vmatpush.msra.mxu1 %v842_v27  ;;  %v841_v32 = vld [vmem:[%s3344_s3 + $0x10] sm:$0xff]  ;;  %v137_v42 = vsel %vm87_vm0, %v1720_v23, 0.0  ;;  %v97_v45 = vsel %vm87_vm0, %v1735_v28, 0.0 }
   0x8   :  { %v840_v33 = vld [vmem:[%s3344_s3 + $0x8] sm:$0xff]  ;;  %v1753_v34 = vld [vmem:[%s3343_s0 + $0x30] sm:$0xff]  ;;  %v134_v36 = vadd.f32 %v133_v25, %v132_v24  ;;  %1569 = vmatpush.msra.mxu2 %v842_v27  ;;  %v1760_v37 = vld [vmem:[%s3343_s0 + $0x38] sm:$0xff]  ;;  %v172_v43 = vsel %vm87_vm0, %v1727_v26, 0.0  ;;  %1570 = vmatpush.msra.mxu3 %v842_v27  ;;  %v139_v48 = vsel %vm87_vm0, %v1740_v30, 0.0  ;;  %v1871_v25 = vpop.eup %1587 }
   0x9   :  { %v94_v38 = vadd.f32 %v93_v22, %v92_v29  ;;  %v1765_v40 = vld [vmem:[%s3343_s0 + $0xb0] sm:$0xff]  ;;  %v1770_v41 = vld [vmem:[%s3343_s0 + $0xb8] sm:$0xff]  ;;  %1048 = vmatpush.msra.mxu0 %v841_v32  ;;  %v99_v46 = vsel %vm87_vm0, %v1753_v34, 0.0  ;;  %v1788_v49 = vld [vmem:[%s3343_s0 + $0x108] sm:$0xff]  ;;  %1571 = vmatpush.msra.mxu1 %v841_v32  ;;  %v101_v54 = vsel %vm87_vm0, %v1760_v37, 0.0  ;;  %vm261_vm1 = vweird.f32 %v1871_v25 }
   0xa   :  { %752 = vperm.xlu1 %1583, %v730_v4   ;;  %742 = vperm.xlu0 %1582, %v728_v10   ;;  %v734_v44 = vld [vmem:[%s3342_s1 + $0x38] sm:$0xff]  ;;  %v136_v47 = vadd.f32 %v135_v31, %v134_v36  ;;  %v1793_v50 = vld [vmem:[%s3343_s0 + $0x110] sm:$0xff]  ;;  %v1808_v55 = vld [vmem:[%s3343_s0 + $0x120] sm:$0xff]  ;;  %v173_v57 = vsel %vm87_vm0, %v1788_v49, 0.0  ;;  %v141_v60 = vsel %vm87_vm0, %v1765_v40, 0.0  ;;  %v143_v61 = vsel %vm87_vm0, %v1770_v41, 0.0 }
   0xb   :  { %v1798_v51 = vld [vmem:[%s3343_s0 + $0x118] sm:$0xff]  ;;  %v733_v52 = vld [vmem:[%s3342_s1 + $0x30] sm:$0xff]  ;;  %1572 = vmatpush.msra.mxu2 %v841_v32  ;;  %v96_v53 = vadd.f32 %v95_v35, %v94_v38  ;;  %v1813_v56 = vld [vmem:[%s3343_s0 + $0x128] sm:$0xff]  ;;  %v175_v58 = vsel %vm87_vm0, %v1793_v50, 0.0  ;;  %1573 = vmatpush.msra.mxu3 %v841_v32  ;;  %v174_v63 = vadd.f32 %v173_v57, %v172_v43  ;;  %v179_v4 = vsel %vm87_vm0, %v1808_v55, 0.0 }
   0xc   :  { %762 = vperm.xlu2 %1584, %v732_v21   ;;  %1049 = vmatpush.msra.mxu0 %v840_v33  ;;  %v138_v59 = vadd.f32 %v137_v42, %v136_v47  ;;  %v1826_v62 = vld [vmem:[%s3343_s0 + $0x130] sm:$0xff]  ;;  %v1831_v0 = vld [vmem:[%s3343_s0 + $0x180] sm:$0xff]  ;;  %v1836_v1 = vld [vmem:[%s3343_s0 + $0x188] sm:$0xff]  ;;  %v177_v3 = vsel %vm87_vm0, %v1798_v51, 0.0  ;;  %v181_v29 = vsel %vm87_vm0, %v1813_v56, 0.0  ;;  %v257_v35 = vmul.f32 64.0, %v1871_v25 }
   0xd   :  { %1574 = vmatpush.msra.mxu1 %v840_v33  ;;  %1575 = vmatpush.msra.mxu2 %v840_v33  ;;  %v98_v2 = vadd.f32 %v97_v45, %v96_v53  ;;  %v1845_v9 = vld [vmem:[%s3343_s0 + $0x190] sm:$0xff]  ;;  %v1850_v10 = vld [vmem:[%s3343_s0 + $0x198] sm:$0xff]  ;;  %v214_v11 = vsel %vm87_vm0, %v1831_v0, 0.0  ;;  %v1244_v12 = vld [vmem:[%s3345_s2] sm:$0xff]  ;;  %v176_v19 = vadd.f32 %v175_v58, %v174_v63  ;;  %v215_v22 = vsel %vm87_vm0, %v1836_v1, 0.0 }
   0xe   :  { %1576 = vmatpush.msra.mxu3 %v840_v33  ;;  %v140_v16 = vadd.f32 %v139_v48, %v138_v59  ;;  %v1860_v20 = vld [vmem:[%s3343_s0 + $0x1a0] sm:$0xff]  ;;  %v1865_v21 = vld [vmem:[%s3343_s0 + $0x1a8] sm:$0xff]  ;;  %v217_v24 = vsel %vm87_vm0, %v1845_v9, 0.0  ;;  %v183_v31 = vsel %vm87_vm0, %v1826_v62, 0.0  ;;  %v216_v32 = vadd.f32 %v215_v22, %v214_v11  ;;  %v1893_v43 = vld [vmem:[%s3343_s0 + $0x50] sm:$0xff] }
   0xf   :  { %v100_v27 = vadd.f32 %v99_v46, %v98_v2  ;;  %v1880_v33 = vld [vmem:[%s3343_s0 + $0x40] sm:$0xff]  ;;  %v178_v38 = vadd.f32 %v177_v3, %v176_v19  ;;  %v219_v39 = vsel %vm87_vm0, %v1850_v10, 0.0  ;;  %v1888_v42 = vld [vmem:[%s3343_s0 + $0x48] sm:$0xff]  ;;  %v221_v46 = vsel %vm87_vm0, %v1860_v20, 0.0  ;;  %v1902_v53 = vld [vmem:[%s3343_s0 + $0x138] sm:$0xff] }
  0x10   :  { %v142_v36 = vadd.f32 %v141_v60, %v140_v16  ;;  %v218_v45 = vadd.f32 %v217_v24, %v216_v32  ;;  %v223_v47 = vsel %vm87_vm0, %v1865_v21, 0.0  ;;  %v258_v48 = vsub.f32 1.0, %v257_v35  ;;  %v1907_v58 = vld [vmem:[%s3343_s0 + $0x58] sm:$0xff]  ;;  %v1914_v60 = vld [vmem:[%s3343_s0 + $0x1b0] sm:$0xff]  ;;  %v1930_v19 = vld [vmem:[%s3343_s0 + $0x60] sm:$0xff] }
  0x11   :  { %v180_v57 = vadd.f32 %v179_v4, %v178_v38  ;;  %v110_v63 = vsel %vm87_vm0, %v1888_v42, 0.0  ;;  %v112_v2 = vsel %vm87_vm0, %v1893_v43, 0.0  ;;  %v1246_v3 = vld [vmem:[%s3345_s2 + $0x10] sm:$0xff]  ;;  %v1245_v4 = vld [vmem:[%s3345_s2 + $0x8] sm:$0xff]  ;;  %v114_v35 = vsel %vm87_vm0, %v1907_v58, 0.0 }
  0x12   :  { %772 = vperm.xlu1 %1583, %v734_v44   ;;  %767 = vperm.xlu0 %1582, %v733_v52   ;;  %v102_v44 = vadd.f32 %v101_v54, %v100_v27  ;;  %v144_v52 = vadd.f32 %v143_v61, %v142_v36  ;;  %v109_v54 = vsel %vm87_vm0, %v1880_v33, 0.0  ;;  %v220_v61 = vadd.f32 %v219_v39, %v218_v45  ;;  %v1247_v36 = vld [vmem:[%s3345_s2 + $0x18] sm:$0xff] }
  0x13   :  { %v259_v11 = vmul.f32 %v1871_v25, %v258_v48  ;;  %v182_v16 = vadd.f32 %v181_v29, %v180_v57  ;;  %v111_v22 = vadd.f32 %v110_v63, %v109_v54  ;;  %v185_v27 = vsel %vm87_vm0, %v1902_v53, 0.0  ;;  %v1942_v39 = vld [vmem:[%s3343_s0 + $0x1b8] sm:$0xff] }
  0x14   :  { %1255 = vperm.xlu2 %1584, %v1244_v12   ;;  %v103_v59 = vrot.slane %v102_v44, 4  ;;  %v145_v12 = vrot.slane %v144_v52, 4  ;;  %v222_v32 = vadd.f32 %v221_v46, %v220_v61  ;;  %v116_v57 = vsel %vm87_vm0, %v1930_v19, 0.0 }
  0x15   :  { %v184_v29 = vadd.f32 %v183_v31, %v182_v16  ;;  %v113_v45 = vadd.f32 %v112_v2, %v111_v22  ;;  %v260_v54 = vadd.f32 %v1871_v25, %v259_v11  ;;  %v1960_v11 = vld [vmem:[%s3343_s0 + $0xc0] sm:$0xff]  ;;  %v1965_v16 = vld [vmem:[%s3343_s0 + $0xc8] sm:$0xff] }
  0x16   :  { %v104_v24 = vadd.f32 %v103_v59, %v102_v44  ;;  %v146_v38 = vadd.f32 %v145_v12, %v144_v52  ;;  %v225_v44 = vsel %vm87_vm0, %v1914_v60, 0.0  ;;  %v224_v48 = vadd.f32 %v223_v47, %v222_v32  ;;  %v1952_v59 = vld [vmem:[%s3343_s0 + $0x68] sm:$0xff]  ;;  %3375 = vst [vmem:[#allocation2_spill] sm:$0xff] %v1965_v16  ;;  %v1248_v32 = vld [vmem:[%s3345_s2 + $0x20] sm:$0xff] }
  0x17   :  { %v186_v31 = vadd.f32 %v185_v27, %v184_v29  ;;  %v115_v61 = vadd.f32 %v114_v35, %v113_v45  ;;  %v227_v47 = vsel %vm87_vm0, %v1942_v39, 0.0  ;;  %v1249_v22 = vld [vmem:[%s3345_s2 + $0x28] sm:$0xff]  ;;  %v118_v27 = vsel %vm87_vm0, %v1952_v59, 0.0  ;;  %v1981_v29 = vld [vmem:[%s3343_s0 + $0x70] sm:$0xff] }
  0x18   :  { %v105_v46 = vrot.slane %v104_v24, 2  ;;  %v147_v52 = vrot.slane %v146_v38, 2  ;;  %v226_v2 = vadd.f32 %v225_v44, %v224_v48  ;;  %v1976_v35 = vsel %vm261_vm1, %v1871_v25, %v260_v54  ;;  %v1986_v44 = vld [vmem:[%s3343_s0 + $0x78] sm:$0xff] }
  0x19   :  { %v117_v12 = vadd.f32 %v116_v57, %v115_v61  ;;  %v151_v25 = vsel %vm87_vm0, %v1960_v11, 0.0  ;;  %v152_v48 = vsel %vm87_vm0, %v1965_v16, 0.0  ;;  %v1250_v57 = vld [vmem:[%s3345_s2 + $0x30] sm:$0xff] }
  0x1a   :  { %1265 = vperm.xlu1 %1583, %v1246_v3   ;;  %1260 = vperm.xlu0 %1582, %v1245_v4   ;;  %v106_v63 = vadd.f32 %v105_v46, %v104_v24  ;;  %v148_v3 = vadd.f32 %v147_v52, %v146_v38  ;;  %v187_v4 = vrot.slane %v186_v31, 4  ;;  %v228_v38 = vadd.f32 %v227_v47, %v226_v2  ;;  %v1991_v46 = vld [vmem:[%s3343_s0 + $0xd0] sm:$0xff] }
  0x1b   :  { %3376 = vst [vmem:[#allocation3_spill] sm:$0xff] %v1991_v46  ;;  %v119_v61 = vadd.f32 %v118_v27, %v117_v12  ;;  %v120_v2 = vsel %vm87_vm0, %v1981_v29, 0.0  ;;  %v122_v47 = vsel %vm87_vm0, %v1986_v44, 0.0 }
  0x1c   :  { %1270 = vperm.xlu2 %1584, %v1247_v36   ;;  %v107_v24 = vrot.slane %v106_v63, 1  ;;  %v149_v36 = vrot.slane %v148_v3, 1  ;;  %v188_v52 = vadd.f32 %v187_v4, %v186_v31  ;;  %v153_v31 = vadd.f32 %v152_v48, %v151_v25 }
  0x1d   :  { %v154_v4 = vsel %vm87_vm0, %v1991_v46, 0.0  ;;  %v121_v25 = vadd.f32 %v120_v2, %v119_v61 }
  0x1e   :  { %v108_v45 = vadd.f32 %v107_v24, %v106_v63  ;;  %v150_v54 = vadd.f32 %v149_v36, %v148_v3  ;;  %v2008_v24 = vld [vmem:[%s3343_s0 + $0xd8] sm:$0xff]  ;;  %v229_v3 = vrot.slane %v228_v38, 4 }
  0x1f   :  { %3377 = vst [vmem:[#allocation4_spill] sm:$0xff] %v2008_v24  ;;  %v156_v48 = vsel %vm87_vm0, %v2008_v24, 0.0 }
  0x20   :  { %v263_v63 = vmul.f32 %v1976_v35, %v108_v45  ;;  %v265_v16 = vmul.f32 %v1976_v35, %v150_v54  ;;  %v189_v45 = vrot.slane %v188_v52, 2 }
  0x22   :  { %1280 = vperm.xlu1 %1583, %v1249_v22   ;;  %1275 = vperm.xlu0 %1582, %v1248_v32   ;;  %v2014_v12 = vsub.f32 %v1657_v5, %v263_v63  ;;  %v2017_v22 = vsub.f32 %v1662_v6, %v263_v63  ;;  %v2020_v27 = vsub.f32 %v1667_v7, %v263_v63 }
  0x23   :  { %v2023_v32 = vsub.f32 %v1672_v8, %v263_v63  ;;  %v2026_v36 = vsub.f32 %v1696_v15, %v263_v63  ;;  %v2031_v5 = vsub.f32 %v1735_v28, %v263_v63  ;;  %v1251_v15 = vld [vmem:[%s3345_s2 + $0x38] sm:$0xff]  ;;  %v2047_v54 = vsub.f32 %v1686_v13, %v265_v16 }
  0x24   :  { %1285 = vperm.xlu2 %1584, %v1250_v57   ;;  %3378 = vst [vmem:[#allocation5_spill] sm:$0xff] %v2014_v12  ;;  %v335_v6 = vmul.f32 %v2014_v12, %v2014_v12  ;;  %v336_v7 = vmul.f32 %v2017_v22, %v2017_v22  ;;  %v337_v8 = vmul.f32 %v2020_v27, %v2020_v27 }
  0x25   :  { %3379 = vst [vmem:[#allocation6_spill] sm:$0xff] %v2017_v22  ;;  %v338_v57 = vmul.f32 %v2023_v32, %v2023_v32  ;;  %v339_v28 = vmul.f32 %v2026_v36, %v2026_v36  ;;  %v2050_v61 = vsub.f32 %v1691_v14, %v265_v16  ;;  %v2053_v2 = vsub.f32 %v1753_v34, %v263_v63 }
  0x26   :  { %3380 = vst [vmem:[#allocation7_spill] sm:$0xff] %v2020_v27  ;;  %v399_v27 = vsel %vm87_vm0, %v335_v6, 0.0  ;;  %v400_v22 = vsel %vm87_vm0, %v336_v7, 0.0  ;;  %v2058_v24 = vsub.f32 %v1701_v17, %v265_v16  ;;  %v402_v12 = vsel %vm87_vm0, %v337_v8, 0.0 }
  0x27   :  { %3381 = vst [vmem:[#allocation8_spill] sm:$0xff] %v2023_v32  ;;  %v401_v32 = vadd.f32 %v400_v22, %v399_v27  ;;  %v155_v13 = vadd.f32 %v154_v4, %v153_v31  ;;  %v2065_v14 = vsub.f32 %v1760_v37, %v263_v63  ;;  %v340_v34 = vmul.f32 %v2031_v5, %v2031_v5 }
  0x28   :  { %3382 = vst [vmem:[#allocation9_spill] sm:$0xff] %v2026_v36  ;;  %v2062_v36 = vsub.f32 %v1706_v18, %v265_v16  ;;  %v404_v6 = vsel %vm87_vm0, %v338_v57, 0.0  ;;  %v230_v7 = vadd.f32 %v229_v3, %v228_v38  ;;  %v406_v17 = vsel %vm87_vm0, %v339_v28, 0.0 }
  0x29   :  { %3383 = vst [vmem:[#allocation10_spill] sm:$0xff] %v2053_v2  ;;  %v403_v46 = vadd.f32 %v402_v12, %v401_v32  ;;  %v2072_v22 = vsub.f32 %v1720_v23, %v265_v16  ;;  %v351_v18 = vmul.f32 %v2047_v54, %v2047_v54  ;;  %v341_v31 = vmul.f32 %v2053_v2, %v2053_v2 }
  0x2a   :  { %1290 = vperm.xlu0 %1582, %v1251_v15   ;;  %3384 = vst [vmem:[#allocation11_spill] sm:$0xff] %v2065_v14  ;;  %v2079_v37 = vsub.f32 %v1740_v30, %v265_v16  ;;  %v352_v63 = vmul.f32 %v2050_v61, %v2050_v61  ;;  %v353_v38 = vmul.f32 %v2058_v24, %v2058_v24  ;;  %v408_v30 = vsel %vm87_vm0, %v340_v34, 0.0 }
  0x2b   :  { %v405_v3 = vadd.f32 %v404_v6, %v403_v46  ;;  %v2086_v4 = vsub.f32 %v1765_v40, %v265_v16  ;;  %v354_v23 = vmul.f32 %v2062_v36, %v2062_v36  ;;  %v190_v12 = vadd.f32 %v189_v45, %v188_v52 }
  0x2c   :  { %v342_v27 = vmul.f32 %v2065_v14, %v2065_v14  ;;  %v2094_v32 = vsub.f32 %v1770_v41, %v265_v16  ;;  %v441_v8 = vsel %vm87_vm0, %v351_v18, 0.0  ;;  %v355_v46 = vmul.f32 %v2072_v22, %v2072_v22  ;;  %v2110_v18 = vld [vmem:[%s3343_s0 + $0xe0] sm:$0xff] }
  0x2d   :  { %3385 = vst [vmem:[#allocation12_spill] sm:$0xff] %v2086_v4  ;;  %v407_v15 = vadd.f32 %v406_v17, %v405_v3  ;;  %v442_v40 = vsel %vm87_vm0, %v352_v63, 0.0  ;;  %v444_v57 = vsel %vm87_vm0, %v353_v38, 0.0  ;;  %v410_v52 = vsel %vm87_vm0, %v341_v31, 0.0 }
  0x2e   :  { %v356_v45 = vmul.f32 %v2079_v37, %v2079_v37  ;;  %v443_v28 = vadd.f32 %v442_v40, %v441_v8  ;;  %v123_v34 = vadd.f32 %v122_v47, %v121_v25  ;;  %v357_v41 = vmul.f32 %v2086_v4, %v2086_v4 }
  0x2f   :  { %v409_v6 = vadd.f32 %v408_v30, %v407_v15  ;;  %v446_v16 = vsel %vm87_vm0, %v354_v23, 0.0  ;;  %v191_v17 = vrot.slane %v190_v12, 1  ;;  %v412_v63 = vsel %vm87_vm0, %v342_v27, 0.0 }
  0x30   :  { %v358_v31 = vmul.f32 %v2094_v32, %v2094_v32  ;;  %v445_v38 = vadd.f32 %v444_v57, %v443_v28  ;;  %v231_v3 = vrot.slane %v230_v7, 2  ;;  %v448_v25 = vsel %vm87_vm0, %v355_v46, 0.0 }
  0x31   :  { %v411_v47 = vadd.f32 %v410_v52, %v409_v6  ;;  %v192_v30 = vadd.f32 %v191_v17, %v190_v12  ;;  %v157_v15 = vadd.f32 %v156_v48, %v155_v13  ;;  %v158_v23 = vsel %vm87_vm0, %v2110_v18, 0.0 }
  0x32   :  { %v447_v8 = vadd.f32 %v446_v16, %v445_v38  ;;  %v450_v14 = vsel %vm87_vm0, %v356_v45, 0.0  ;;  %v452_v4 = vsel %vm87_vm0, %v357_v41, 0.0  ;;  %v454_v57 = vsel %vm87_vm0, %v358_v31, 0.0 }
  0x33   :  { %v413_v40 = vadd.f32 %v412_v63, %v411_v47  ;;  %v267_v27 = vmul.f32 %v1976_v35, %v192_v30  ;;  %v232_v28 = vadd.f32 %v231_v3, %v230_v7  ;;  %v124_v52 = vrot.slane %v123_v34, 4  ;;  %v2140_v7 = vld [vmem:[%s3343_s0 + $0xe8] sm:$0xff] }
  0x34   :  { %v449_v2 = vadd.f32 %v448_v25, %v447_v8 }
  0x35   :  { %v414_v6 = vrot.slane %v413_v40, 4  ;;  %v2123_v12 = vsub.f32 %v1727_v26, %v267_v27  ;;  %v2126_v48 = vsub.f32 %v1788_v49, %v267_v27  ;;  %v2129_v13 = vsub.f32 %v1793_v50, %v267_v27 }
  0x36   :  { %v451_v46 = vadd.f32 %v450_v14, %v449_v2  ;;  %v2132_v45 = vsub.f32 %v1798_v51, %v267_v27  ;;  %v2135_v41 = vsub.f32 %v1808_v55, %v267_v27  ;;  %v159_v26 = vadd.f32 %v158_v23, %v157_v15 }
  0x37   :  { %v415_v16 = vadd.f32 %v414_v6, %v413_v40  ;;  %v2143_v49 = vsub.f32 %v1813_v56, %v267_v27  ;;  %v2146_v50 = vsub.f32 %v1826_v62, %v267_v27  ;;  %v367_v51 = vmul.f32 %v2123_v12, %v2123_v12 }
  0x38   :  { %v453_v2 = vadd.f32 %v452_v4, %v451_v46  ;;  %v368_v55 = vmul.f32 %v2126_v48, %v2126_v48  ;;  %v369_v14 = vmul.f32 %v2129_v13, %v2129_v13  ;;  %v370_v17 = vmul.f32 %v2132_v45, %v2132_v45 }
  0x39   :  { %v416_v63 = vrot.slane %v415_v16, 2  ;;  %v233_v31 = vrot.slane %v232_v28, 1  ;;  %v125_v56 = vadd.f32 %v124_v52, %v123_v34  ;;  %v160_v62 = vsel %vm87_vm0, %v2140_v7, 0.0 }
  0x3a   :  { %v455_v38 = vadd.f32 %v454_v57, %v453_v2  ;;  %v371_v3 = vmul.f32 %v2135_v41, %v2135_v41  ;;  %v483_v4 = vsel %vm87_vm0, %v367_v51, 0.0  ;;  %v484_v47 = vsel %vm87_vm0, %v368_v55, 0.0 }
  0x3b   :  { %v417_v25 = vadd.f32 %v416_v63, %v415_v16  ;;  %v2163_v30 = vsub.f32 %v1902_v53, %v267_v27  ;;  %v485_v8 = vadd.f32 %v484_v47, %v483_v4  ;;  %v486_v15 = vsel %vm87_vm0, %v369_v14, 0.0  ;;  %v2174_v53 = vld [vmem:[%s3343_s0 + $0xf0] sm:$0xff] }
  0x3c   :  { %v456_v23 = vrot.slane %v455_v38, 4  ;;  %v372_v34 = vmul.f32 %v2143_v49, %v2143_v49  ;;  %v373_v40 = vmul.f32 %v2146_v50, %v2146_v50  ;;  %v488_v57 = vsel %vm87_vm0, %v370_v17, 0.0 }
  0x3d   :  { %v418_v52 = vrot.slane %v417_v25, 1  ;;  %v487_v6 = vadd.f32 %v486_v15, %v485_v8  ;;  %v234_v46 = vadd.f32 %v233_v31, %v232_v28  ;;  %v490_v16 = vsel %vm87_vm0, %v371_v3, 0.0 }
  0x3e   :  { %v457_v27 = vadd.f32 %v456_v23, %v455_v38  ;;  %v126_v51 = vrot.slane %v125_v56, 2  ;;  %v374_v2 = vmul.f32 %v2163_v30, %v2163_v30  ;;  %v161_v63 = vadd.f32 %v160_v62, %v159_v26 }
  0x3f   :  { %v489_v55 = vadd.f32 %v488_v57, %v487_v6  ;;  %v269_v14 = vmul.f32 %v1976_v35, %v234_v46  ;;  %v492_v4 = vsel %vm87_vm0, %v372_v34, 0.0  ;;  %v494_v28 = vsel %vm87_vm0, %v373_v40, 0.0 }
  0x40   :  { %v458_v17 = vrot.slane %v457_v27, 2  ;;  %v162_v31 = vsel %vm87_vm0, %v2174_v53, 0.0  ;;  %v419_v47 = vadd.f32 %v418_v52, %v417_v25  ;;  %v127_v62 = vadd.f32 %v126_v51, %v125_v56  ;;  %v2200_v25 = vld [vmem:[%s3343_s0 + $0xf8] sm:$0xff] }
  0x41   :  { %v491_v38 = vadd.f32 %v490_v16, %v489_v55  ;;  %v2185_v3 = vsub.f32 %v1831_v0, %v269_v14  ;;  %v2188_v8 = vsub.f32 %v1836_v1, %v269_v14  ;;  %v2191_v23 = vsub.f32 %v1845_v9, %v269_v14 }
  0x42   :  { %v459_v15 = vadd.f32 %v458_v17, %v457_v27  ;;  %v2194_v26 = vsub.f32 %v1850_v10, %v269_v14  ;;  %v496_v40 = vsel %vm87_vm0, %v374_v2, 0.0  ;;  %v163_v0 = vadd.f32 %v162_v31, %v161_v63 }
  0x43   :  { %v493_v34 = vadd.f32 %v492_v4, %v491_v38  ;;  %v2203_v1 = vsub.f32 %v1860_v20, %v269_v14  ;;  %v383_v9 = vmul.f32 %v2185_v3, %v2185_v3  ;;  %v384_v10 = vmul.f32 %v2188_v8, %v2188_v8 }
  0x44   :  { %v460_v57 = vrot.slane %v459_v15, 1  ;;  %v567_v56 = vmul.f32 %v419_v47, %v1976_v35  ;;  %v385_v6 = vmul.f32 %v2191_v23, %v2191_v23  ;;  %v386_v46 = vmul.f32 %v2194_v26, %v2194_v26 }
  0x45   :  { %v495_v52 = vadd.f32 %v494_v28, %v493_v34  ;;  %v2215_v16 = vsub.f32 %v1865_v21, %v269_v14  ;;  %v128_v20 = vrot.slane %v127_v62, 1  ;;  %v164_v51 = vsel %vm87_vm0, %v2200_v25, 0.0 }
  0x46   :  { %v461_v27 = vadd.f32 %v460_v57, %v459_v15  ;;  %v2220_v55 = vsub.f32 %v1914_v60, %v269_v14  ;;  %v525_v63 = vsel %vm87_vm0, %v383_v9, 0.0  ;;  %v526_v17 = vsel %vm87_vm0, %v384_v10, 0.0 }
  0x47   :  { %v497_v2 = vadd.f32 %v496_v40, %v495_v52  ;;  %v387_v28 = vmul.f32 %v2203_v1, %v2203_v1  ;;  %v527_v31 = vadd.f32 %v526_v17, %v525_v63  ;;  %v528_v21 = vsel %vm87_vm0, %v385_v6, 0.0  ;;  %v2253_v63 = vld [vmem:[%s3343_s0 + $0x140] sm:$0xff] }
  0x48   :  { %3386 = vst [vmem:[#allocation13_spill] sm:$0xff] %v2220_v55  ;;  %v569_v4 = vmul.f32 %v461_v27, %v1976_v35  ;;  %v2228_v47 = vadd.f32 1e-05, %v567_v56  ;;  %v530_v15 = vsel %vm87_vm0, %v386_v46, 0.0  ;;  %v165_v34 = vadd.f32 %v164_v51, %v163_v0 }
  0x49   :  { %v498_v38 = vrot.slane %v497_v2, 4  ;;  %v2232_v60 = vsub.f32 %v1942_v39, %v269_v14  ;;  %v388_v40 = vmul.f32 %v2215_v16, %v2215_v16  ;;  %v529_v57 = vadd.f32 %v528_v21, %v527_v31 }
  0x4a   :  { %v129_v9 = vadd.f32 %v128_v20, %v127_v62  ;;  %v2236_v10 = vadd.f32 1e-05, %v569_v4  ;;  %v389_v6 = vmul.f32 %v2220_v55, %v2220_v55  ;;  %v532_v27 = vsel %vm87_vm0, %v387_v28, 0.0  ;;  %v2262_v28 = vld [vmem:[%s3343_s0 + $0x148] sm:$0xff] }
  0x4b   :  { %3387 = vst [vmem:[#allocation14_spill] sm:$0xff] %v2232_v60  ;;  %v499_v52 = vadd.f32 %v498_v38, %v497_v2  ;;  %v531_v56 = vadd.f32 %v530_v15, %v529_v57  ;;  %1589 = vrsqrt.f32 %v2228_v47  ;;  %v390_v14 = vmul.f32 %v2232_v60, %v2232_v60  ;;  %v839_v38 = vld [vmem:[%s3344_s3] sm:$0xff] }
  0x4c   :  { %v264_v46 = vmul.f32 %v1976_v35, %v129_v9  ;;  %v534_v0 = vsel %vm87_vm0, %v388_v40, 0.0  ;;  %v166_v62 = vrot.slane %v165_v34, 4  ;;  %1591 = vrsqrt.f32 %v2236_v10  ;;  %1050 = vmatpush.msra.mxu0 %v839_v38  ;;  %1577 = vmatpush.msra.mxu1 %v839_v38 }
  0x4d   :  { %v500_v39 = vrot.slane %v499_v52, 2  ;;  %v533_v51 = vadd.f32 %v532_v27, %v531_v56  ;;  %v536_v17 = vsel %vm87_vm0, %v389_v6, 0.0  ;;  %v538_v15 = vsel %vm87_vm0, %v390_v14, 0.0  ;;  %1578 = vmatpush.msra.mxu2 %v839_v38  ;;  %1579 = vmatpush.msra.mxu3 %v839_v38 }
  0x4e   :  { %v2248_v2 = vsub.f32 %v1880_v33, %v264_v46  ;;  %v2257_v4 = vsub.f32 %v1888_v42, %v264_v46  ;;  %v2265_v33 = vsub.f32 %v1893_v43, %v264_v46  ;;  %v2272_v40 = vsub.f32 %v1907_v58, %v264_v46 }
  0x4f   :  { %v501_v20 = vadd.f32 %v500_v39, %v499_v52  ;;  %v535_v21 = vadd.f32 %v534_v0, %v533_v51  ;;  %v167_v42 = vadd.f32 %v166_v62, %v165_v34  ;;  %v193_v57 = vsel %vm87_vm0, %v2253_v63, 0.0  ;;  %v2295_v62 = vld [vmem:[%s3343_s0 + $0x150] sm:$0xff] }
  0x50   :  { %3388 = vst [vmem:[#allocation15_spill] sm:$0xff] %v2248_v2  ;;  %v343_v6 = vmul.f32 %v2248_v2, %v2248_v2  ;;  %v194_v56 = vsel %vm87_vm0, %v2262_v28, 0.0  ;;  %v344_v58 = vmul.f32 %v2257_v4, %v2257_v4  ;;  %v2288_v14 = vsub.f32 %v1930_v19, %v264_v46 }
  0x51   :  { %3389 = vst [vmem:[#allocation16_spill] sm:$0xff] %v2257_v4  ;;  %v502_v31 = vrot.slane %v501_v20, 1  ;;  %v2276_v9 = vpop.eup %1589  ;;  %v537_v43 = vadd.f32 %v536_v17, %v535_v21  ;;  %v345_v0 = vmul.f32 %v2265_v33, %v2265_v33  ;;  %v2300_v51 = vsub.f32 %v1952_v59, %v264_v46 }
  0x52   :  { %3390 = vst [vmem:[#allocation17_spill] sm:$0xff] %v2265_v33  ;;  %v2284_v34 = vpop.eup %1591  ;;  %v168_v17 = vrot.slane %v167_v42, 2  ;;  %v346_v38 = vmul.f32 %v2272_v40, %v2272_v40  ;;  %v421_v33 = vsel %vm87_vm0, %v344_v58, 0.0  ;;  %v196_v59 = vsel %vm87_vm0, %v2295_v62, 0.0 }
  0x53   :  { %3391 = vst [vmem:[#allocation18_spill] sm:$0xff] %v2272_v40  ;;  %v503_v52 = vadd.f32 %v502_v31, %v501_v20  ;;  %v539_v39 = vadd.f32 %v538_v15, %v537_v43  ;;  %v584_v20 = vmul.f32 %v2276_v9, %v2228_v47  ;;  %v195_v31 = vadd.f32 %v194_v56, %v193_v57 }
  0x54   :  { %3392 = vst [vmem:[#allocation19_spill] sm:$0xff] %v2288_v14  ;;  %v420_v15 = vsel %vm87_vm0, %v343_v6, 0.0  ;;  %v2310_v43 = vsub.f32 %v1981_v29, %v264_v46  ;;  %v347_v56 = vmul.f32 %v2288_v14, %v2288_v14  ;;  %v2321_v40 = vsub.f32 %v1986_v44, %v264_v46 }
  0x55   :  { %v571_v27 = vmul.f32 %v503_v52, %v1976_v35  ;;  %3393 = vst [vmem:[#allocation20_spill] sm:$0xff] %v2300_v51  ;;  %v540_v19 = vrot.slane %v539_v39, 4  ;;  %v604_v52 = vmul.f32 %v2284_v34, %v2236_v10  ;;  %v585_v6 = vmul.f32 %v2276_v9, %v584_v20 }
  0x56   :  { %3394 = vst [vmem:[#allocation21_spill] sm:$0xff] %v2310_v43  ;;  %v422_v29 = vadd.f32 %v421_v33, %v420_v15  ;;  %v348_v58 = vmul.f32 %v2300_v51, %v2300_v51  ;;  %v425_v2 = vsel %vm87_vm0, %v346_v38, 0.0  ;;  %v169_v60 = vadd.f32 %v168_v17, %v167_v42  ;;  %v2338_v42 = vld [vmem:[%s3343_s0 + $0x160] sm:$0xff] }
  0x57   :  { %v2302_v21 = vadd.f32 1e-05, %v571_v27  ;;  %v541_v57 = vadd.f32 %v540_v19, %v539_v39  ;;  %v423_v27 = vsel %vm87_vm0, %v345_v0, 0.0  ;;  %3395 = vst [vmem:[#allocation22_spill] sm:$0xff] %v2321_v40  ;;  %v2329_v39 = vld [vmem:[%s3343_s0 + $0x158] sm:$0xff]  ;;  %v605_v0 = vmul.f32 %v2284_v34, %v604_v52 }
  0x58   :  { %v424_v19 = vadd.f32 %v423_v27, %v422_v29  ;;  %v197_v20 = vadd.f32 %v196_v59, %v195_v31  ;;  %v349_v44 = vmul.f32 %v2310_v43, %v2310_v43  ;;  %v427_v46 = vsel %vm87_vm0, %v347_v56, 0.0 }
  0x59   :  { %1593 = vrsqrt.f32 %v2302_v21  ;;  %v542_v4 = vrot.slane %v541_v57, 2  ;;  %v170_v33 = vrot.slane %v169_v60, 1  ;;  %v198_v38 = vsel %vm87_vm0, %v2329_v39, 0.0 }
  0x5a   :  { %v426_v17 = vadd.f32 %v425_v2, %v424_v19  ;;  %v586_v52 = vmul.f32 0.5, %v585_v6  ;;  %v429_v31 = vsel %vm87_vm0, %v348_v58, 0.0  ;;  %v606_v59 = vmul.f32 0.5, %v605_v0 }
  0x5b   :  { %v543_v14 = vadd.f32 %v542_v4, %v541_v57  ;;  %v350_v4 = vmul.f32 %v2321_v40, %v2321_v40  ;;  %v200_v29 = vsel %vm87_vm0, %v2338_v42, 0.0  ;;  %v431_v2 = vsel %vm87_vm0, %v349_v44, 0.0 }
  0x5c   :  { %v428_v56 = vadd.f32 %v427_v46, %v426_v17  ;;  %v171_v19 = vadd.f32 %v170_v33, %v169_v60  ;;  %v199_v51 = vadd.f32 %v198_v38, %v197_v20  ;;  %vm589_vm2 = vweird.f32 %v2228_v47 }
  0x5d   :  { %v544_v27 = vrot.slane %v543_v14, 1  ;;  %vm590_vm3 = vweird.f32 %v2276_v9  ;;  %v587_v55 = vsub.f32 1.5, %v586_v52  ;;  %vm609_vm4 = vweird.f32 %v2236_v10  ;;  %v2396_v10 = vld [vmem:[%s3343_s0 + $0x178] sm:$0xff] }
  0x5e   :  { %v430_v40 = vadd.f32 %v429_v31, %v428_v56  ;;  %v433_v0 = vsel %vm87_vm0, %v350_v4, 0.0  ;;  %v607_v60 = vsub.f32 1.5, %v606_v59  ;;  %vm610_vm5 = vweird.f32 %v2284_v34  ;;  %vm591_vm8 = vmor %vm589_vm2, %vm590_vm3  ;;  %v3396_v31 = vld [vmem:[#allocation2_spill] sm:$0xff] }
  0x5f   :  { %v1594_v15 = vpop.eup %1593  ;;  %v545_v43 = vadd.f32 %v544_v27, %v543_v14  ;;  %v2357_v14 = vld [vmem:[%s3343_s0 + $0x168] sm:$0xff]  ;;  %vm629_vm6 = vweird.f32 %v2302_v21  ;;  %v2362_v33 = vmul.f32 %v1976_v35, %v171_v19  ;;  %v201_v17 = vadd.f32 %v200_v29, %v199_v51  ;;  %vm611_vm9 = vmor %vm609_vm4, %vm610_vm5 }
  0x60   :  { %v624_v57 = vmul.f32 %v1594_v15, %v2302_v21  ;;  %v432_v44 = vadd.f32 %v431_v2, %v430_v40  ;;  %vm630_vm7 = vweird.f32 %v1594_v15  ;;  %v202_v52 = vsel %vm87_vm0, %v2357_v14, 0.0  ;;  %v2373_v40 = vld [vmem:[%s3343_s0 + $0x170] sm:$0xff]  ;;  %v3397_v19 = vld [vmem:[#allocation3_spill] sm:$0xff] }
  0x61   :  { %v573_v58 = vmul.f32 %v545_v43, %v1976_v35  ;;  %v588_v27 = vmul.f32 %v2276_v9, %v587_v55  ;;  %v608_v51 = vmul.f32 %v2284_v34, %v607_v60  ;;  %vm631_vm10 = vmor %vm629_vm6, %vm630_vm7  ;;  %v2385_v47 = vsub.f32 %v1960_v11, %v2362_v33 }
  0x62   :  { %v625_v6 = vmul.f32 %v1594_v15, %v624_v57  ;;  %v434_v38 = vadd.f32 %v433_v0, %v432_v44  ;;  %v2389_v59 = vsub.f32 %v3396_v31, %v2362_v33  ;;  %v203_v55 = vadd.f32 %v202_v52, %v201_v17  ;;  %v3399_v44 = vld [vmem:[#allocation5_spill] sm:$0xff] }
  0x63   :  { %v581_v46 = vadd.f32 1e-05, %v573_v58  ;;  %v204_v56 = vsel %vm87_vm0, %v2373_v40, 0.0  ;;  %v2399_v21 = vsel %vm591_vm8, %v2276_v9, %v588_v27  ;;  %v2402_v11 = vsel %vm611_vm9, %v2284_v34, %v608_v51  ;;  %v3400_v27 = vld [vmem:[#allocation4_spill] sm:$0xff] }
  0x64   :  { %v626_v20 = vmul.f32 0.5, %v625_v6  ;;  %v435_v57 = vrot.slane %v434_v38, 4  ;;  %v2408_v6 = vsub.f32 %v3397_v19, %v2362_v33  ;;  %v359_v58 = vmul.f32 %v2385_v47, %v2385_v47 }
  0x65   :  { %1595 = vrsqrt.f32 %v581_v46  ;;  %v360_v0 = vmul.f32 %v2389_v59, %v2389_v59  ;;  %v205_v60 = vadd.f32 %v204_v56, %v203_v55  ;;  %v206_v34 = vsel %vm87_vm0, %v2396_v10, 0.0 }
  0x66   :  { %v627_v43 = vsub.f32 1.5, %v626_v20  ;;  %3398 = vst [vmem:[#allocation2_spill] sm:$0xff] %v2408_v6  ;;  %v436_v9 = vadd.f32 %v435_v57, %v434_v38  ;;  %v679_v17 = vmul.f32 %v2402_v11, %v2047_v54  ;;  %v2424_v51 = vsub.f32 %v3400_v27, %v2362_v33  ;;  %v2433_v54 = vld [vmem:[%s3343_s0 + $0x1c0] sm:$0xff] }
  0x67   :  { %v361_v38 = vmul.f32 %v2408_v6, %v2408_v6  ;;  %v463_v31 = vsel %vm87_vm0, %v360_v0, 0.0  ;;  %v207_v55 = vadd.f32 %v206_v34, %v205_v60  ;;  %vm649_vm11 = vweird.f32 %v581_v46  ;;  %v3404_v6 = vld [vmem:[#allocation7_spill] sm:$0xff] }
  0x68   :  { %v628_v4 = vmul.f32 %v1594_v15, %v627_v43  ;;  %3401 = vst [vmem:[#allocation3_spill] sm:$0xff] %v2424_v51  ;;  %v437_v19 = vrot.slane %v436_v9, 2 }
  0x6a   :  { %v2404_v29 = vsel %vm631_vm10, %v1594_v15, %v628_v4  ;;  %v663_v15 = vmul.f32 %v2399_v21, %v3399_v44  ;;  %v462_v4 = vsel %vm87_vm0, %v359_v58, 0.0  ;;  %v235_v44 = vsel %vm87_vm0, %v2433_v54, 0.0 }
  0x6b   :  { %v1596_v2 = vpop.eup %1595  ;;  %v695_v43 = vmul.f32 %v2404_v29, %v2123_v12  ;;  %v2438_v12 = vld [vmem:[%s3343_s0 + $0x1c8] sm:$0xff]  ;;  %v464_v34 = vadd.f32 %v463_v31, %v462_v4  ;;  %v438_v4 = vadd.f32 %v437_v19, %v436_v9  ;;  %v2461_v31 = vsub.f32 %v2140_v7, %v2362_v33 }
  0x6c   :  { %v644_v20 = vmul.f32 %v1596_v2, %v581_v46  ;;  %vm650_vm12 = vweird.f32 %v1596_v2  ;;  %v236_v27 = vsel %vm87_vm0, %v2438_v12, 0.0  ;;  %v2453_v46 = vsub.f32 %v2110_v18, %v2362_v33 }
  0x6d   :  { %vm651_vm13 = vmor %vm649_vm11, %vm650_vm12  ;;  %v680_v18 = vmul.f32 %v2402_v11, %v2050_v61  ;;  %v2478_v7 = vsub.f32 %v2174_v53, %v2362_v33  ;;  %v237_v19 = vadd.f32 %v236_v27, %v235_v44  ;;  %v364_v53 = vmul.f32 %v2461_v31, %v2461_v31 }
  0x6e   :  { %v645_v52 = vmul.f32 %v1596_v2, %v644_v20  ;;  %v363_v61 = vmul.f32 %v2453_v46, %v2453_v46 }
  0x6f   :  { %3403 = vst [vmem:[#allocation5_spill] sm:$0xff] %v2478_v7 }
  0x70   :  { %v646_v56 = vmul.f32 0.5, %v645_v52 }
  0x72   :  { %v647_v20 = vsub.f32 1.5, %v646_v56  ;;  %v3402_v56 = vld [vmem:[#allocation6_spill] sm:$0xff] }
  0x74   :  { %v2440_v57 = vpop.permute.xlu0 %737  ;;  %v648_v52 = vmul.f32 %v1596_v2, %v647_v20 }
  0x75   :  { %v775_v58 = vmul.f32 %v2440_v57, %v663_v15  ;;  %v791_v0 = vmul.f32 %v2440_v57, %v679_v17  ;;  %v807_v60 = vmul.f32 %v2440_v57, %v695_v43  ;;  %v362_v15 = vmul.f32 %v2424_v51, %v2424_v51 }
  0x76   :  { %v465_v17 = vsel %vm87_vm0, %v361_v38, 0.0  ;;  %v208_v43 = vrot.slane %v207_v55, 4  ;;  %v2472_v38 = vld [vmem:[%s3343_s0 + $0x1d0] sm:$0xff] }
  0x77   :  { %1504 = vmatmul.msk.f32.vlgmr.msra.gmra.mxu0 %vm87_vm0, %v775_v58  ;;  %1520 = vmatmul.msk.f32.vlgmr.msra.gmra.mxu1 %vm87_vm0, %v791_v0  ;;  %v664_v58 = vmul.f32 %v2399_v21, %v3402_v56  ;;  %v696_v0 = vmul.f32 %v2404_v29, %v2126_v48  ;;  %v466_v9 = vadd.f32 %v465_v17, %v464_v34  ;;  %v467_v48 = vsel %vm87_vm0, %v362_v15, 0.0 }
  0x78   :  { %1536 = vmatmul.msk.f32.vlgmr.msra.gmra.mxu2 %vm87_vm0, %v807_v60  ;;  %v2474_v60 = vsel %vm651_vm13, %v1596_v2, %v648_v52  ;;  %v209_v56 = vadd.f32 %v208_v43, %v207_v55  ;;  %v665_v2 = vmul.f32 %v2399_v21, %v3404_v6  ;;  %v439_v52 = vrot.slane %v438_v4, 1 }
  0x79   :  { %v711_v20 = vmul.f32 %v2474_v60, %v2185_v3  ;;  %v238_v34 = vsel %vm87_vm0, %v2472_v38, 0.0  ;;  %v681_v15 = vmul.f32 %v2402_v11, %v2058_v24  ;;  %v2501_v6 = vsub.f32 %v2200_v25, %v2362_v33 }
  0x7a   :  { %v365_v17 = vmul.f32 %v2478_v7, %v2478_v7  ;;  %v468_v43 = vadd.f32 %v467_v48, %v466_v9  ;;  %v712_v24 = vmul.f32 %v2474_v60, %v2188_v8  ;;  %v697_v25 = vmul.f32 %v2404_v29, %v2129_v13 }
  0x7b   :  { %v823_v3 = vmul.f32 %v2440_v57, %v711_v20  ;;  %3405 = vst [vmem:[#allocation4_spill] sm:$0xff] %v2501_v6  ;;  %v2508_v20 = vld [vmem:[%s3343_s0 + $0x1d8] sm:$0xff]  ;;  %v469_v33 = vsel %vm87_vm0, %v363_v61, 0.0  ;;  %v471_v9 = vsel %vm87_vm0, %v364_v53, 0.0  ;;  %v366_v8 = vmul.f32 %v2501_v6, %v2501_v6 }
  0x7c   :  { %v2485_v51 = vpop.permute.xlu0 %742  ;;  %v240_v48 = vsel %vm87_vm0, %v2508_v20, 0.0  ;;  %v470_v13 = vadd.f32 %v469_v33, %v468_v43  ;;  %v473_v61 = vsel %vm87_vm0, %v365_v17, 0.0 }
  0x7d   :  { %v776_v44 = vmul.f32 %v2485_v51, %v664_v58  ;;  %v792_v27 = vmul.f32 %v2485_v51, %v680_v18  ;;  %v808_v55 = vmul.f32 %v2485_v51, %v696_v0  ;;  %1552 = vmatmul.msk.f32.vlgmr.msra.gmra.mxu3 %vm87_vm0, %v823_v3  ;;  %v210_v58 = vrot.slane %v209_v56, 2  ;;  %v2522_v3 = vpop.permute.xlu1 %747 }
  0x7e   :  { %v440_v18 = vadd.f32 %v439_v52, %v438_v4  ;;  %v239_v0 = vadd.f32 %v238_v34, %v237_v19  ;;  %v824_v4 = vmul.f32 %v2485_v51, %v712_v24  ;;  %v777_v19 = vmul.f32 %v2522_v3, %v665_v2  ;;  %v2543_v24 = vld [vmem:[%s3343_s0 + $0x1e8] sm:$0xff] }
  0x7f   :  { %1505 = vmatmul.msk.f32.gmra.mxu0 %vm87_vm0, %v776_v44  ;;  %1521 = vmatmul.msk.f32.gmra.mxu1 %vm87_vm0, %v792_v27  ;;  %v211_v44 = vadd.f32 %v210_v58, %v209_v56  ;;  %v2530_v27 = vld [vmem:[%s3343_s0 + $0x1e0] sm:$0xff]  ;;  %v793_v52 = vmul.f32 %v2522_v3, %v681_v15  ;;  %v809_v53 = vmul.f32 %v2522_v3, %v697_v25  ;;  %v475_v17 = vsel %vm87_vm0, %v366_v8, 0.0  ;;  %v3406_v58 = vld [vmem:[#allocation8_spill] sm:$0xff] }
  0x80   :  { %1537 = vmatmul.msk.f32.gmra.mxu2 %vm87_vm0, %v808_v55  ;;  %v568_v34 = vmul.f32 %v440_v18, %v1976_v35  ;;  %v472_v55 = vadd.f32 %v471_v9, %v470_v13  ;;  %v241_v33 = vadd.f32 %v240_v48, %v239_v0  ;;  %v242_v56 = vsel %vm87_vm0, %v2530_v27, 0.0 }
  0x81   :  { %v212_v43 = vrot.slane %v211_v44, 1  ;;  %v713_v2 = vmul.f32 %v2474_v60, %v2191_v23  ;;  %v666_v18 = vmul.f32 %v2399_v21, %v3406_v58  ;;  %v682_v48 = vmul.f32 %v2402_v11, %v2062_v36  ;;  %v2571_v36 = vld [vmem:[%s3343_s0 + $0x1f0] sm:$0xff] }
  0x82   :  { %v474_v15 = vadd.f32 %v473_v61, %v472_v55  ;;  %v2553_v0 = vadd.f32 1e-05, %v568_v34  ;;  %v243_v9 = vadd.f32 %v242_v56, %v241_v33  ;;  %v244_v23 = vsel %vm87_vm0, %v2543_v24, 0.0 }
  0x83   :  { %v213_v25 = vadd.f32 %v212_v43, %v211_v44  ;;  %v698_v61 = vmul.f32 %v2404_v29, %v2132_v45  ;;  %v3407_v44 = vld [vmem:[#allocation9_spill] sm:$0xff] }
  0x84   :  { %v476_v8 = vadd.f32 %v475_v17, %v474_v15  ;;  %1597 = vrsqrt.f32 %v2553_v0  ;;  %v245_v33 = vadd.f32 %v244_v23, %v243_v9  ;;  %vm599_vm14 = vweird.f32 %v2553_v0 }
  0x85   :  { %1553 = vmatmul.msk.f32.gmra.mxu3 %vm87_vm0, %v824_v4  ;;  %v268_v13 = vmul.f32 %v1976_v35, %v213_v25  ;;  %v667_v4 = vmul.f32 %v2399_v21, %v3407_v44  ;;  %v2580_v43 = vpop.permute.xlu1 %752 }
  0x86   :  { %v477_v34 = vrot.slane %v476_v8, 4  ;;  %v778_v56 = vmul.f32 %v2580_v43, %v666_v18 }
  0x87   :  { %1506 = vmatmul.msk.f32.gmra.mxu0 %vm87_vm0, %v777_v19  ;;  %1522 = vmatmul.msk.f32.gmra.mxu1 %vm87_vm0, %v793_v52  ;;  %v683_v19 = vmul.f32 %v2402_v11, %v2072_v22  ;;  %v699_v52 = vmul.f32 %v2404_v29, %v2135_v41  ;;  %v2575_v55 = vsub.f32 %v2253_v63, %v268_v13 }
  0x88   :  { %1538 = vmatmul.msk.f32.gmra.mxu2 %vm87_vm0, %v809_v53  ;;  %v825_v53 = vmul.f32 %v2522_v3, %v713_v2  ;;  %v2578_v45 = vsub.f32 %v2262_v28, %v268_v13  ;;  %v2584_v22 = vsub.f32 %v2295_v62, %v268_v13  ;;  %v2587_v41 = vsub.f32 %v2329_v39, %v268_v13  ;;  %v2596_v28 = vld [vmem:[%s3343_s0 + $0x1f8] sm:$0xff] }
  0x89   :  { %v478_v17 = vadd.f32 %v477_v34, %v476_v8  ;;  %v2591_v63 = vsub.f32 %v2338_v42, %v268_v13  ;;  %v246_v2 = vsel %vm87_vm0, %v2571_v36, 0.0  ;;  %v794_v62 = vmul.f32 %v2580_v43, %v682_v48 }
  0x8a   :  { %v810_v39 = vmul.f32 %v2580_v43, %v698_v61  ;;  %v2603_v15 = vsub.f32 %v2357_v14, %v268_v13  ;;  %v375_v25 = vmul.f32 %v2575_v55, %v2575_v55  ;;  %v376_v58 = vmul.f32 %v2578_v45, %v2578_v45  ;;  %v2622_v61 = vpop.permute.xlu2 %757 }
  0x8b   :  { %v479_v42 = vrot.slane %v478_v17, 2  ;;  %v377_v18 = vmul.f32 %v2584_v22, %v2584_v22  ;;  %v378_v9 = vmul.f32 %v2587_v41, %v2587_v41  ;;  %v714_v14 = vmul.f32 %v2474_v60, %v2194_v26 }
  0x8c   :  { %3408 = vst [vmem:[#allocation6_spill] sm:$0xff] %v2603_v15  ;;  %v504_v48 = vsel %vm87_vm0, %v375_v25, 0.0  ;;  %v247_v8 = vadd.f32 %v246_v2, %v245_v33  ;;  %v248_v23 = vsel %vm87_vm0, %v2596_v28, 0.0  ;;  %v379_v34 = vmul.f32 %v2591_v63, %v2591_v63 }
  0x8d   :  { %1554 = vmatmul.msk.f32.gmra.mxu3 %vm87_vm0, %v825_v53  ;;  %v480_v44 = vadd.f32 %v479_v42, %v478_v17  ;;  %v2625_v53 = vsub.f32 %v2373_v40, %v268_v13  ;;  %v779_v26 = vmul.f32 %v2622_v61, %v667_v4  ;;  %v507_v33 = vsel %vm87_vm0, %v377_v18, 0.0 }
  0x8e   :  { %v2635_v25 = vsub.f32 %v2396_v10, %v268_v13  ;;  %v380_v40 = vmul.f32 %v2603_v15, %v2603_v15  ;;  %v509_v17 = vsel %vm87_vm0, %v378_v9, 0.0  ;;  %v795_v42 = vmul.f32 %v2622_v61, %v683_v19 }
  0x8f   :  { %1507 = vmatmul.msk.f32.gmra.mxu0 %vm87_vm0, %v778_v56  ;;  %1523 = vmatmul.msk.f32.gmra.mxu1 %vm87_vm0, %v794_v62  ;;  %v505_v56 = vsel %vm87_vm0, %v376_v58, 0.0  ;;  %v2630_v62 = vpop.eup %1597  ;;  %v481_v2 = vrot.slane %v480_v44, 1  ;;  %v811_v58 = vmul.f32 %v2622_v61, %v699_v52  ;;  %v249_v7 = vadd.f32 %v248_v23, %v247_v8 }
  0x90   :  { %1539 = vmatmul.msk.f32.gmra.mxu2 %vm87_vm0, %v810_v39  ;;  %v506_v39 = vadd.f32 %v505_v56, %v504_v48  ;;  %v826_v4 = vmul.f32 %v2580_v43, %v714_v14  ;;  %v381_v18 = vmul.f32 %v2625_v53, %v2625_v53  ;;  %v511_v10 = vsel %vm87_vm0, %v379_v34, 0.0 }
  0x91   :  { %v482_v48 = vadd.f32 %v481_v2, %v480_v44  ;;  %v594_v13 = vmul.f32 %v2630_v62, %v2553_v0  ;;  %v250_v15 = vrot.slane %v249_v7, 4  ;;  %v715_v19 = vmul.f32 %v2474_v60, %v2203_v1 }
  0x92   :  { %v508_v6 = vadd.f32 %v507_v33, %v506_v39  ;;  %v382_v9 = vmul.f32 %v2635_v25, %v2635_v25  ;;  %v513_v14 = vsel %vm87_vm0, %v380_v40, 0.0  ;;  %v668_v23 = vmul.f32 %v2399_v21, %v2031_v5 }
  0x93   :  { %v570_v52 = vmul.f32 %v482_v48, %v1976_v35  ;;  %v251_v8 = vadd.f32 %v250_v15, %v249_v7  ;;  %v684_v44 = vmul.f32 %v2402_v11, %v2079_v37  ;;  %v515_v34 = vsel %vm87_vm0, %v381_v18, 0.0  ;;  %v2671_v7 = vpop.permute.xlu2 %762 }
  0x94   :  { %v510_v56 = vadd.f32 %v509_v17, %v508_v6  ;;  %v595_v39 = vmul.f32 %v2630_v62, %v594_v13  ;;  %v827_v40 = vmul.f32 %v2622_v61, %v715_v19  ;;  %v517_v5 = vsel %vm87_vm0, %v382_v9, 0.0  ;;  %v3410_v19 = vld [vmem:[#allocation12_spill] sm:$0xff] }
  0x95   :  { %1555 = vmatmul.msk.f32.gmra.mxu3 %vm87_vm0, %v826_v4  ;;  %v2662_v1 = vadd.f32 1e-05, %v570_v52  ;;  %v252_v2 = vrot.slane %v251_v8, 2  ;;  %v780_v17 = vmul.f32 %v2671_v7, %v668_v23  ;;  %v716_v18 = vmul.f32 %v2474_v60, %v2215_v16  ;;  %v3411_v16 = vld [vmem:[#allocation11_spill] sm:$0xff] }
  0x96   :  { %v512_v6 = vadd.f32 %v511_v10, %v510_v56  ;;  %v3409_v10 = vld [vmem:[#allocation10_spill] sm:$0xff]  ;;  %v2682_v56 = vpop.permute.xlu0 %767  ;;  %v685_v52 = vmul.f32 %v2402_v11, %v3410_v19  ;;  %v670_v23 = vmul.f32 %v2399_v21, %v3411_v16  ;;  %vm600_vm15 = vweird.f32 %v2630_v62 }
  0x97   :  { %1508 = vmatmul.msk.f32.gmra.mxu0 %vm87_vm0, %v779_v26  ;;  %1524 = vmatmul.msk.f32.gmra.mxu1 %vm87_vm0, %v795_v42  ;;  %v700_v26 = vmul.f32 %v2404_v29, %v2143_v49  ;;  %1599 = vrsqrt.f32 %v2662_v1  ;;  %v253_v15 = vadd.f32 %v252_v2, %v251_v8  ;;  %v796_v42 = vmul.f32 %v2671_v7, %v684_v44  ;;  %vm601_vm3 = vmor %vm599_vm14, %vm600_vm15 }
  0x98   :  { %1540 = vmatmul.msk.f32.gmra.mxu2 %vm87_vm0, %v811_v58  ;;  %v514_v33 = vadd.f32 %v513_v14, %v512_v6  ;;  %v596_v58 = vmul.f32 0.5, %v595_v39  ;;  %v669_v13 = vmul.f32 %v2399_v21, %v3409_v10  ;;  %v701_v8 = vmul.f32 %v2404_v29, %v2146_v50 }
  0x99   :  { %v812_v49 = vmul.f32 %v2671_v7, %v700_v26  ;;  %v254_v48 = vrot.slane %v253_v15, 1  ;;  %v686_v44 = vmul.f32 %v2402_v11, %v2094_v32  ;;  %vm619_vm1 = vweird.f32 %v2662_v1 }
  0x9a   :  { %v516_v37 = vadd.f32 %v515_v34, %v514_v33  ;;  %v702_v34 = vmul.f32 %v2404_v29, %v2163_v30  ;;  %v597_v26 = vsub.f32 1.5, %v596_v58  ;;  %v781_v50 = vmul.f32 %v2682_v56, %v669_v13 }
  0x9b   :  { %v255_v14 = vadd.f32 %v254_v48, %v253_v15  ;;  %v813_v15 = vmul.f32 %v2682_v56, %v701_v8 }
  0x9c   :  { %v518_v4 = vadd.f32 %v517_v5, %v516_v37  ;;  %v3412_v5 = vld [vmem:[#allocation13_spill] sm:$0xff]  ;;  %v797_v37 = vmul.f32 %v2682_v56, %v685_v52  ;;  %v2747_v52 = vpop.permute.xlu1 %772 }
  0x9d   :  { %1556 = vmatmul.msk.f32.gmra.mxu3 %vm87_vm0, %v827_v40  ;;  %v2688_v6 = vpop.eup %1599  ;;  %v270_v2 = vmul.f32 %v1976_v35, %v255_v14  ;;  %v828_v40 = vmul.f32 %v2671_v7, %v716_v18  ;;  %v717_v21 = vmul.f32 %v2474_v60, %v3412_v5  ;;  %v798_v5 = vmul.f32 %v2747_v52, %v686_v44 }
  0x9e   :  { %v519_v9 = vrot.slane %v518_v4, 4  ;;  %v614_v39 = vmul.f32 %v2688_v6, %v2662_v1  ;;  %vm620_vm2 = vweird.f32 %v2688_v6  ;;  %v814_v0 = vmul.f32 %v2747_v52, %v702_v34 }
  0x9f   :  { %1509 = vmatmul.msk.f32.gmra.mxu0 %vm87_vm0, %v780_v17  ;;  %1525 = vmatmul.msk.f32.gmra.mxu1 %vm87_vm0, %v796_v42  ;;  %v2708_v30 = vsub.f32 %v2433_v54, %v270_v2  ;;  %v2711_v29 = vsub.f32 %v2438_v12, %v270_v2  ;;  %v2716_v17 = vsub.f32 %v2472_v38, %v270_v2  ;;  %vm621_vm4 = vmor %vm619_vm1, %vm620_vm2 }
  0xa0   :  { %1541 = vmatmul.msk.f32.gmra.mxu2 %vm87_vm0, %v812_v49  ;;  %v520_v33 = vadd.f32 %v519_v9, %v518_v4  ;;  %v615_v32 = vmul.f32 %v2688_v6, %v614_v39  ;;  %v2719_v42 = vsub.f32 %v2508_v20, %v270_v2  ;;  %v598_v49 = vmul.f32 %v2630_v62, %v597_v26 }
  0xa1   :  { %v2723_v54 = vsub.f32 %v2530_v27, %v270_v2  ;;  %v391_v12 = vmul.f32 %v2708_v30, %v2708_v30  ;;  %v392_v38 = vmul.f32 %v2711_v29, %v2711_v29  ;;  %v393_v20 = vmul.f32 %v2716_v17, %v2716_v17 }
  0xa2   :  { %v521_v11 = vrot.slane %v520_v33, 2  ;;  %v616_v58 = vmul.f32 0.5, %v615_v32  ;;  %v2737_v18 = vsub.f32 %v2543_v24, %v270_v2  ;;  %v394_v10 = vmul.f32 %v2719_v42, %v2719_v42 }
  0xa3   :  { %v2744_v13 = vsub.f32 %v2571_v36, %v270_v2  ;;  %v546_v19 = vsel %vm87_vm0, %v391_v12, 0.0  ;;  %v395_v14 = vmul.f32 %v2723_v54, %v2723_v54  ;;  %v547_v24 = vsel %vm87_vm0, %v392_v38, 0.0 }
  0xa4   :  { %v522_v4 = vadd.f32 %v521_v11, %v520_v33  ;;  %v617_v27 = vsub.f32 1.5, %v616_v58  ;;  %v549_v8 = vsel %vm87_vm0, %v393_v20, 0.0  ;;  %v829_v16 = vmul.f32 %v2682_v56, %v717_v21 }
  0xa5   :  { %1557 = vmatmul.msk.f32.gmra.mxu3 %vm87_vm0, %v828_v40  ;;  %v548_v1 = vadd.f32 %v547_v24, %v546_v19  ;;  %v2761_v39 = vsub.f32 %v2596_v28, %v270_v2  ;;  %v396_v33 = vmul.f32 %v2737_v18, %v2737_v18  ;;  %v551_v40 = vsel %vm87_vm0, %v394_v10, 0.0 }
  0xa6   :  { %v523_v48 = vrot.slane %v522_v4, 1  ;;  %v618_v36 = vmul.f32 %v2688_v6, %v617_v27  ;;  %v2770_v32 = vsel %vm601_vm3, %v2630_v62, %v598_v49  ;;  %v397_v28 = vmul.f32 %v2744_v13, %v2744_v13  ;;  %v3414_v49 = vld [vmem:[#allocation15_spill] sm:$0xff] }
  0xa7   :  { %1510 = vmatmul.msk.f32.gmra.mxu0 %vm87_vm0, %v781_v50  ;;  %1526 = vmatmul.msk.f32.gmra.mxu1 %vm87_vm0, %v797_v37  ;;  %v782_v50 = vmul.f32 %v2747_v52, %v670_v23  ;;  %v550_v21 = vadd.f32 %v549_v8, %v548_v1  ;;  %v553_v2 = vsel %vm87_vm0, %v395_v14, 0.0  ;;  %v398_v62 = vmul.f32 %v2761_v39, %v2761_v39  ;;  %v3413_v37 = vld [vmem:[#allocation14_spill] sm:$0xff] }
  0xa8   :  { %1542 = vmatmul.msk.f32.gmra.mxu2 %vm87_vm0, %v813_v15  ;;  %v524_v9 = vadd.f32 %v523_v48, %v522_v4  ;;  %v2778_v23 = vsel %vm621_vm4, %v2688_v6, %v618_v36  ;;  %v555_v34 = vsel %vm87_vm0, %v396_v33, 0.0  ;;  %v718_v15 = vmul.f32 %v2474_v60, %v3413_v37  ;;  %v3416_v37 = vld [vmem:[#allocation17_spill] sm:$0xff] }
  0xa9   :  { %v552_v44 = vadd.f32 %v551_v40, %v550_v21  ;;  %v671_v58 = vmul.f32 %v2770_v32, %v3414_v49  ;;  %v687_v6 = vmul.f32 %v2778_v23, %v2385_v47  ;;  %v557_v12 = vsel %vm87_vm0, %v397_v28, 0.0  ;;  %v3415_v40 = vld [vmem:[#allocation16_spill] sm:$0xff]  ;;  %v3417_v49 = vld [vmem:[#allocation2_spill] sm:$0xff] }
  0xaa   :  { %v572_v26 = vmul.f32 %v524_v9, %v1976_v35  ;;  %v559_v20 = vsel %vm87_vm0, %v398_v62, 0.0  ;;  %v830_v27 = vmul.f32 %v2747_v52, %v718_v15  ;;  %v673_v15 = vmul.f32 %v2770_v32, %v3416_v37 }
  0xab   :  { %v554_v4 = vadd.f32 %v553_v2, %v552_v44  ;;  %v783_v48 = vmul.f32 %v2440_v57, %v671_v58  ;;  %v799_v60 = vmul.f32 %v2440_v57, %v687_v6  ;;  %v689_v58 = vmul.f32 %v2778_v23, %v3417_v49 }
  0xac   :  { %v580_v11 = vadd.f32 1e-05, %v572_v26 }
  0xad   :  { %1558 = vmatmul.msk.f32.gmra.mxu3 %vm87_vm0, %v829_v16  ;;  %v556_v38 = vadd.f32 %v555_v34, %v554_v4  ;;  %v785_v4 = vmul.f32 %v2522_v3, %v673_v15  ;;  %v801_v6 = vmul.f32 %v2522_v3, %v689_v58 }
  0xae   :  { %1601 = vrsqrt.f32 %v580_v11  ;;  %vm639_vm5 = vweird.f32 %v580_v11 }
  0xaf   :  { %1511 = vmatmul.msk.f32.gmra.mxu0 %vm87_vm0, %v782_v50  ;;  %1527 = vmatmul.msk.f32.gmra.mxu1 %vm87_vm0, %v798_v5  ;;  %v558_v10 = vadd.f32 %v557_v12, %v556_v38  ;;  %v672_v50 = vmul.f32 %v2770_v32, %v3415_v40  ;;  %v688_v5 = vmul.f32 %v2778_v23, %v2389_v59  ;;  %v3418_v12 = vld [vmem:[#allocation18_spill] sm:$0xff] }
  0xb0   :  { %1543 = vmatmul.msk.f32.gmra.mxu2 %vm87_vm0, %v814_v0  ;;  %v674_v38 = vmul.f32 %v2770_v32, %v3418_v12 }
  0xb1   :  { %v560_v14 = vadd.f32 %v559_v20, %v558_v10  ;;  %v784_v28 = vmul.f32 %v2485_v51, %v672_v50  ;;  %v3419_v20 = vld [vmem:[#allocation3_spill] sm:$0xff] }
  0xb3   :  { %v561_v24 = vrot.slane %v560_v14, 4 }
  0xb4   :  { %v1602_v19 = vpop.eup %1601 }
  0xb5   :  { %1559 = vmatmul.msk.f32.gmra.mxu3 %vm87_vm0, %v830_v27  ;;  %v634_v9 = vmul.f32 %v1602_v19, %v580_v11  ;;  %vm640_vm6 = vweird.f32 %v1602_v19  ;;  %v562_v16 = vadd.f32 %v561_v24, %v560_v14  ;;  %v800_v11 = vmul.f32 %v2485_v51, %v688_v5 }
  0xb6   :  { %vm641_vm7 = vmor %vm639_vm5, %vm640_vm6  ;;  %v690_v27 = vmul.f32 %v2778_v23, %v3419_v20 }
  0xb7   :  { %1512 = vmatmul.msk.f32.gmra.mxu0 %vm87_vm0, %v783_v48  ;;  %1528 = vmatmul.msk.f32.gmra.mxu1 %vm87_vm0, %v799_v60  ;;  %v635_v47 = vmul.f32 %v1602_v19, %v634_v9  ;;  %v563_v1 = vrot.slane %v562_v16, 2 }
  0xb8   :  { %v802_v60 = vmul.f32 %v2580_v43, %v690_v27  ;;  %v1256_v27 = vpop.permute.xlu2 %1255 }
  0xb9   :  { %v636_v8 = vmul.f32 0.5, %v635_v47  ;;  %v564_v33 = vadd.f32 %v563_v1, %v562_v16  ;;  %v691_v16 = vmul.f32 %v2778_v23, %v2453_v46 }
  0xbb   :  { %v637_v36 = vsub.f32 1.5, %v636_v8  ;;  %v565_v21 = vrot.slane %v564_v33, 1  ;;  %v3420_v8 = vld [vmem:[#allocation19_spill] sm:$0xff]  ;;  %v803_v40 = vmul.f32 %v2622_v61, %v691_v16 }
  0xbd   :  { %v638_v26 = vmul.f32 %v1602_v19, %v637_v36  ;;  %v566_v44 = vadd.f32 %v565_v21, %v564_v33  ;;  %v3421_v21 = vld [vmem:[#allocation20_spill] sm:$0xff] }
  0xbf   :  { %v2803_v0 = vsel %vm641_vm7, %v1602_v19, %v638_v26  ;;  %1513 = vmatmul.msk.f32.gmra.mxu0 %vm87_vm0, %v784_v28  ;;  %1529 = vmatmul.msk.f32.gmra.mxu1 %vm87_vm0, %v800_v11  ;;  %v574_v34 = vmul.f32 %v566_v44, %v1976_v35  ;;  %v786_v19 = vmul.f32 %v2580_v43, %v674_v38 }
  0xc0   :  { %v703_v2 = vmul.f32 %v2803_v0, %v2575_v55  ;;  %v704_v55 = vmul.f32 %v2803_v0, %v2578_v45  ;;  %v705_v10 = vmul.f32 %v2803_v0, %v2584_v22  ;;  %v675_v22 = vmul.f32 %v2770_v32, %v3420_v8 }
  0xc1   :  { %v582_v59 = vadd.f32 1e-05, %v574_v34  ;;  %v706_v1 = vmul.f32 %v2803_v0, %v2587_v41  ;;  %v676_v41 = vmul.f32 %v2770_v32, %v3421_v21  ;;  %v692_v28 = vmul.f32 %v2778_v23, %v2461_v31  ;;  %v1266_v21 = vpop.permute.xlu1 %1265 }
  0xc2   :  { %v815_v62 = vmul.f32 %v2440_v57, %v703_v2  ;;  %v816_v35 = vmul.f32 %v2485_v51, %v704_v55  ;;  %v817_v47 = vmul.f32 %v2522_v3, %v705_v10  ;;  %v787_v26 = vmul.f32 %v2622_v61, %v675_v22 }
  0xc3   :  { %1603 = vrsqrt.f32 %v582_v59  ;;  %vm659_vm8 = vweird.f32 %v582_v59  ;;  %v818_v5 = vmul.f32 %v2580_v43, %v706_v1  ;;  %v788_v2 = vmul.f32 %v2671_v7, %v676_v41 }
  0xc4   :  { %1544 = vmatmul.msk.f32.gmra.mxu2 %vm87_vm0, %v815_v62  ;;  %v3422_v62 = vld [vmem:[#allocation21_spill] sm:$0xff]  ;;  %v709_v12 = vmul.f32 %v2803_v0, %v2625_v53 }
  0xc5   :  { %v677_v34 = vmul.f32 %v2770_v32, %v3422_v62 }
  0xc7   :  { %1514 = vmatmul.msk.f32.gmra.mxu0 %vm87_vm0, %v785_v4  ;;  %1530 = vmatmul.msk.f32.gmra.mxu1 %vm87_vm0, %v801_v6  ;;  %v789_v49 = vmul.f32 %v2682_v56, %v677_v34  ;;  %v3425_v4 = vld [vmem:[#allocation22_spill] sm:$0xff] }
  0xc8   :  { %v678_v6 = vmul.f32 %v2770_v32, %v3425_v4  ;;  %v2902_v32 = vld [vmem:[%s3346_s4] ss:$0 sm:$0xff] }
  0xc9   :  { %v1604_v45 = vpop.eup %1603 }
  0xca   :  { %v654_v48 = vmul.f32 %v1604_v45, %v582_v59  ;;  %vm660_vm9 = vweird.f32 %v1604_v45  ;;  %v3424_v59 = vld [vmem:[#allocation6_spill] sm:$0xff]  ;;  %v790_v20 = vmul.f32 %v2747_v52, %v678_v6 }
  0xcb   :  { %vm661_vm10 = vmor %vm659_vm8, %vm660_vm9  ;;  %v708_v37 = vmul.f32 %v2803_v0, %v3424_v59 }
  0xcc   :  { %1545 = vmatmul.msk.f32.gmra.mxu2 %vm87_vm0, %v816_v35  ;;  %v655_v9 = vmul.f32 %v1604_v45, %v654_v48  ;;  %v3426_v35 = vld [vmem:[#allocation4_spill] sm:$0xff]  ;;  %v2915_v48 = vld [vmem:[%s3347_s5] ss:$0 sm:$0xff] }
  0xcd   :  { %v820_v58 = vmul.f32 %v2671_v7, %v708_v37 }
  0xce   :  { %v656_v14 = vmul.f32 0.5, %v655_v9 }
  0xcf   :  { %1515 = vmatmul.msk.f32.gmra.mxu0 %vm87_vm0, %v786_v19  ;;  %1531 = vmatmul.msk.f32.gmra.mxu1 %vm87_vm0, %v802_v60  ;;  %v710_v19 = vmul.f32 %v2803_v0, %v2635_v25 }
  0xd0   :  { %v657_v24 = vsub.f32 1.5, %v656_v14 }
  0xd1   :  { %v822_v22 = vmul.f32 %v2747_v52, %v710_v19 }
  0xd2   :  { %v658_v36 = vmul.f32 %v1604_v45, %v657_v24  ;;  %v1261_v24 = vpop.permute.xlu0 %1260 }
  0xd4   :  { %1546 = vmatmul.msk.f32.gmra.mxu2 %vm87_vm0, %v817_v47  ;;  %v2845_v33 = vsel %vm661_vm10, %v1604_v45, %v658_v36 }
  0xd5   :  { %v719_v50 = vmul.f32 %v2845_v33, %v2708_v30  ;;  %v707_v30 = vmul.f32 %v2803_v0, %v2591_v63  ;;  %v720_v11 = vmul.f32 %v2845_v33, %v2711_v29  ;;  %v3423_v63 = vld [vmem:[#allocation5_spill] sm:$0xff]  ;;  %v721_v15 = vmul.f32 %v2845_v33, %v2716_v17 }
  0xd6   :  { %v693_v29 = vmul.f32 %v2778_v23, %v3423_v63  ;;  %v694_v17 = vmul.f32 %v2778_v23, %v3426_v35  ;;  %v722_v38 = vmul.f32 %v2845_v33, %v2719_v42  ;;  %v821_v23 = vmul.f32 %v2682_v56, %v709_v12 }
  0xd7   :  { %1516 = vmatmul.msk.f32.gmra.mxu0 %vm87_vm0, %v787_v26  ;;  %1532 = vmatmul.msk.f32.gmra.mxu1 %vm87_vm0, %v803_v40  ;;  %v831_v46 = vmul.f32 %v2440_v57, %v719_v50  ;;  %v804_v57 = vmul.f32 %v2671_v7, %v692_v28  ;;  %v819_v44 = vmul.f32 %v2622_v61, %v707_v30 }
  0xd8   :  { %v832_v31 = vmul.f32 %v2485_v51, %v720_v11  ;;  %v805_v51 = vmul.f32 %v2682_v56, %v693_v29  ;;  %v833_v55 = vmul.f32 %v2522_v3, %v721_v15  ;;  %v806_v3 = vmul.f32 %v2747_v52, %v694_v17 }
  0xd9   :  { %1560 = vmatmul.msk.f32.gmra.mxu3 %vm87_vm0, %v831_v46  ;;  %v834_v53 = vmul.f32 %v2580_v43, %v722_v38  ;;  %v2908_v42 = vmul.f32 %v2902_v32, %v1256_v27  ;;  %v723_v9 = vmul.f32 %v2845_v33, %v2723_v54  ;;  %v2937_v54 = vmul.f32 %v2902_v32, %v1261_v24 }
  0xda   :  { %v724_v40 = vmul.f32 %v2845_v33, %v2737_v18  ;;  %v725_v34 = vmul.f32 %v2845_v33, %v2744_v13  ;;  %v726_v12 = vmul.f32 %v2845_v33, %v2761_v39 }
  0xdb   :  { %v835_v0 = vmul.f32 %v2622_v61, %v723_v9 }
  0xdc   :  { %1547 = vmatmul.msk.f32.gmra.mxu2 %vm87_vm0, %v818_v5  ;;  %v836_v11 = vmul.f32 %v2671_v7, %v724_v40 }
  0xdf   :  { %1517 = vmatmul.msk.f32.gmra.mxu0 %vm87_vm0, %v788_v2  ;;  %1533 = vmatmul.msk.f32.gmra.mxu1 %vm87_vm0, %v804_v57  ;;  %v2965_v2 = vmul.f32 %v2902_v32, %v1266_v21 }
  0xe1   :  { %1561 = vmatmul.msk.f32.gmra.mxu3 %vm87_vm0, %v832_v31 }
  0xe4   :  { %1548 = vmatmul.msk.f32.gmra.mxu2 %vm87_vm0, %v819_v44 }
  0xe7   :  { %1518 = vmatmul.msk.f32.gmra.mxu0 %vm87_vm0, %v789_v49  ;;  %1534 = vmatmul.msk.f32.gmra.mxu1 %vm87_vm0, %v805_v51  ;;  %v1271_v51 = vpop.permute.xlu2 %1270 }
  0xe9   :  { %1562 = vmatmul.msk.f32.gmra.mxu3 %vm87_vm0, %v833_v55  ;;  %v2996_v55 = vmul.f32 %v2902_v32, %v1271_v51 }
  0xec   :  { %1549 = vmatmul.msk.f32.gmra.mxu2 %vm87_vm0, %v820_v58  ;;  %v837_v58 = vmul.f32 %v2682_v56, %v725_v34 }
  0xef   :  { %1519 = vmatmul.msk.f32.gmra.mxu0 %vm87_vm0, %v790_v20  ;;  %1535 = vmatmul.msk.f32.gmra.mxu1 %vm87_vm0, %v806_v3 }
  0xf1   :  { %1563 = vmatmul.msk.f32.gmra.mxu3 %vm87_vm0, %v834_v53 }
  0xf4   :  { %1550 = vmatmul.msk.f32.gmra.mxu2 %vm87_vm0, %v821_v23  ;;  %v1052_v45 = vpop.f32.mrf.mxu0  ;;  %v1100_v10 = vpop.f32.mrf.mxu1 }
  0xf5   :  { %v1304_v60 = vadd.f32 %v2908_v42, %v1052_v45  ;;  %v1320_v43 = vadd.f32 %v2908_v42, %v1100_v10  ;;  %v1276_v23 = vpop.permute.xlu0 %1275  ;;  %v838_v10 = vmul.f32 %v2747_v52, %v726_v12 }
  0xf6   :  { %v3027_v33 = vmul.f32 %v2902_v32, %v1276_v23 }
  0xf7   :  { %v1372_v14 = vadd.f32 %v2915_v48, %v1304_v60  ;;  %v1388_v47 = vadd.f32 %v2915_v48, %v1320_v43 }
  0xf9   :  { %1436 = vst.msk [vmem:[%s3348_s6] sm:$0xff] %vm87_vm0, %v1372_v14  ;;  %1564 = vmatmul.msk.f32.gmra.mxu3 %vm87_vm0, %v835_v0 }
  0xfa   :  { %1452 = vst.msk [vmem:[%s3348_s6 + $0x80] sm:$0xff] %vm87_vm0, %v1388_v47 }
  0xfb   :  { %v1148_v8 = vpop.f32.mrf.mxu2 }
  0xfc   :  { %v1336_v25 = vadd.f32 %v2908_v42, %v1148_v8  ;;  %1551 = vmatmul.msk.f32.gmra.mxu2 %vm87_vm0, %v822_v22  ;;  %v1055_v36 = vpop.f32.mrf.mxu0  ;;  %v1103_v1 = vpop.f32.mrf.mxu1 }
  0xfd   :  { %v1305_v61 = vadd.f32 %v2937_v54, %v1055_v36  ;;  %v1321_v26 = vadd.f32 %v2937_v54, %v1103_v1  ;;  %v1281_v8 = vpop.permute.xlu1 %1280 }
  0xfe   :  { %v1404_v16 = vadd.f32 %v2915_v48, %v1336_v25  ;;  %v3055_v36 = vmul.f32 %v2902_v32, %v1281_v8 }
  0xff   :  { %v1373_v5 = vadd.f32 %v2915_v48, %v1305_v61  ;;  %v1389_v46 = vadd.f32 %v2915_v48, %v1321_v26 }
 0x100   :  { %1468 = vst.msk [vmem:[%s3348_s6 + $0x100] sm:$0xff] %vm87_vm0, %v1404_v16  ;;  %v1196_v50 = vpop.f32.mrf.mxu3 }
 0x101   :  { %v1352_v41 = vadd.f32 %v2908_v42, %v1196_v50  ;;  %1437 = vst.msk [vmem:[%s3348_s6 + $0x8] sm:$0xff] %vm87_vm0, %v1373_v5  ;;  %1565 = vmatmul.msk.f32.gmra.mxu3 %vm87_vm0, %v836_v11 }
 0x102   :  { %1453 = vst.msk [vmem:[%s3348_s6 + $0x88] sm:$0xff] %vm87_vm0, %v1389_v46 }
 0x103   :  { %v1151_v28 = vpop.f32.mrf.mxu2  ;;  %v1420_v18 = vadd.f32 %v2915_v48, %v1352_v41  ;;  %v1286_v41 = vpop.permute.xlu2 %1285 }
 0x104   :  { %v1337_v30 = vadd.f32 %v2937_v54, %v1151_v28  ;;  %v1058_v7 = vpop.f32.mrf.mxu0  ;;  %v1106_v44 = vpop.f32.mrf.mxu1 }
 0x105   :  { %1484 = vst.msk [vmem:[%s3348_s6 + $0x180] sm:$0xff] %vm87_vm0, %v1420_v18  ;;  %v1306_v31 = vadd.f32 %v2965_v2, %v1058_v7  ;;  %v1322_v62 = vadd.f32 %v2965_v2, %v1106_v44 }
 0x106   :  { %v1405_v57 = vadd.f32 %v2915_v48, %v1337_v30 }
 0x107   :  { %v1374_v29 = vadd.f32 %v2915_v48, %v1306_v31  ;;  %v1390_v59 = vadd.f32 %v2915_v48, %v1322_v62 }
 0x108   :  { %1469 = vst.msk [vmem:[%s3348_s6 + $0x108] sm:$0xff] %vm87_vm0, %v1405_v57  ;;  %v1199_v63 = vpop.f32.mrf.mxu3  ;;  %v3082_v57 = vmul.f32 %v2902_v32, %v1286_v41 }
 0x109   :  { %v1353_v37 = vadd.f32 %v2937_v54, %v1199_v63  ;;  %1438 = vst.msk [vmem:[%s3348_s6 + $0x10] sm:$0xff] %vm87_vm0, %v1374_v29  ;;  %1566 = vmatmul.msk.f32.gmra.mxu3 %vm87_vm0, %v837_v58 }
 0x10a   :  { %1454 = vst.msk [vmem:[%s3348_s6 + $0x90] sm:$0xff] %vm87_vm0, %v1390_v59 }
 0x10b   :  { %v1154_v15 = vpop.f32.mrf.mxu2  ;;  %v1421_v13 = vadd.f32 %v2915_v48, %v1353_v37  ;;  %v1291_v37 = vpop.permute.xlu0 %1290 }
 0x10c   :  { %v1338_v49 = vadd.f32 %v2965_v2, %v1154_v15  ;;  %v1061_v56 = vpop.f32.mrf.mxu0  ;;  %v1109_v6 = vpop.f32.mrf.mxu1 }
 0x10d   :  { %1485 = vst.msk [vmem:[%s3348_s6 + $0x188] sm:$0xff] %vm87_vm0, %v1421_v13  ;;  %v1307_v35 = vadd.f32 %v2996_v55, %v1061_v56  ;;  %v1323_v17 = vadd.f32 %v2996_v55, %v1109_v6  ;;  %v3109_v13 = vmul.f32 %v2902_v32, %v1291_v37 }
 0x10e   :  { %v1406_v4 = vadd.f32 %v2915_v48, %v1338_v49 }
 0x10f   :  { %v1375_v20 = vadd.f32 %v2915_v48, %v1307_v35  ;;  %v1391_v3 = vadd.f32 %v2915_v48, %v1323_v17 }
 0x110   :  { %1470 = vst.msk [vmem:[%s3348_s6 + $0x110] sm:$0xff] %vm87_vm0, %v1406_v4  ;;  %v1202_v38 = vpop.f32.mrf.mxu3 }
 0x111   :  { %v1354_v27 = vadd.f32 %v2965_v2, %v1202_v38  ;;  %1439 = vst.msk [vmem:[%s3348_s6 + $0x18] sm:$0xff] %vm87_vm0, %v1375_v20  ;;  %1567 = vmatmul.msk.f32.gmra.mxu3 %vm87_vm0, %v838_v10 }
 0x112   :  { %1455 = vst.msk [vmem:[%s3348_s6 + $0x98] sm:$0xff] %vm87_vm0, %v1391_v3 }
 0x113   :  { %v1157_v53 = vpop.f32.mrf.mxu2  ;;  %v1422_v39 = vadd.f32 %v2915_v48, %v1354_v27 }
 0x114   :  { %v1339_v45 = vadd.f32 %v2996_v55, %v1157_v53  ;;  %v1064_v52 = vpop.f32.mrf.mxu0  ;;  %v1112_v60 = vpop.f32.mrf.mxu1 }
 0x115   :  { %1486 = vst.msk [vmem:[%s3348_s6 + $0x190] sm:$0xff] %vm87_vm0, %v1422_v39  ;;  %v1308_v43 = vadd.f32 %v3027_v33, %v1064_v52  ;;  %v1324_v9 = vadd.f32 %v3027_v33, %v1112_v60 }
 0x116   :  { %v1407_v19 = vadd.f32 %v2915_v48, %v1339_v45 }
 0x117   :  { %v1376_v47 = vadd.f32 %v2915_v48, %v1308_v43  ;;  %v1392_v24 = vadd.f32 %v2915_v48, %v1324_v9 }
 0x118   :  { %1471 = vst.msk [vmem:[%s3348_s6 + $0x118] sm:$0xff] %vm87_vm0, %v1407_v19  ;;  %v1205_v14 = vpop.f32.mrf.mxu3 }
 0x119   :  { %v1355_v22 = vadd.f32 %v2996_v55, %v1205_v14  ;;  %1440 = vst.msk [vmem:[%s3348_s6 + $0x20] sm:$0xff] %vm87_vm0, %v1376_v47 }
 0x11a   :  { %1456 = vst.msk [vmem:[%s3348_s6 + $0xa0] sm:$0xff] %vm87_vm0, %v1392_v24 }
 0x11b   :  { %v1160_v25 = vpop.f32.mrf.mxu2  ;;  %v1423_v16 = vadd.f32 %v2915_v48, %v1355_v22 }
 0x11c   :  { %v1340_v0 = vadd.f32 %v3027_v33, %v1160_v25  ;;  %v1067_v61 = vpop.f32.mrf.mxu0  ;;  %v1115_v26 = vpop.f32.mrf.mxu1 }
 0x11d   :  { %1487 = vst.msk [vmem:[%s3348_s6 + $0x198] sm:$0xff] %vm87_vm0, %v1423_v16  ;;  %v1309_v40 = vadd.f32 %v3055_v36, %v1067_v61  ;;  %v1325_v50 = vadd.f32 %v3055_v36, %v1115_v26 }
 0x11e   :  { %v1408_v1 = vadd.f32 %v2915_v48, %v1340_v0 }
 0x11f   :  { %v1377_v46 = vadd.f32 %v2915_v48, %v1309_v40  ;;  %v1393_v21 = vadd.f32 %v2915_v48, %v1325_v50 }
 0x120   :  { %1472 = vst.msk [vmem:[%s3348_s6 + $0x120] sm:$0xff] %vm87_vm0, %v1408_v1  ;;  %v1208_v5 = vpop.f32.mrf.mxu3 }
 0x121   :  { %v1356_v28 = vadd.f32 %v3027_v33, %v1208_v5  ;;  %1441 = vst.msk [vmem:[%s3348_s6 + $0x28] sm:$0xff] %vm87_vm0, %v1377_v46 }
 0x122   :  { %1457 = vst.msk [vmem:[%s3348_s6 + $0xa8] sm:$0xff] %vm87_vm0, %v1393_v21 }
 0x123   :  { %v1163_v30 = vpop.f32.mrf.mxu2  ;;  %v1424_v18 = vadd.f32 %v2915_v48, %v1356_v28 }
 0x124   :  { %v1341_v11 = vadd.f32 %v3055_v36, %v1163_v30  ;;  %v1070_v44 = vpop.f32.mrf.mxu0  ;;  %v1118_v31 = vpop.f32.mrf.mxu1 }
 0x125   :  { %1488 = vst.msk [vmem:[%s3348_s6 + $0x1a0] sm:$0xff] %vm87_vm0, %v1424_v18  ;;  %v1310_v62 = vadd.f32 %v3082_v57, %v1070_v44  ;;  %v1326_v34 = vadd.f32 %v3082_v57, %v1118_v31 }
 0x126   :  { %v1409_v7 = vadd.f32 %v2915_v48, %v1341_v11 }
 0x127   :  { %v1378_v29 = vadd.f32 %v2915_v48, %v1310_v62  ;;  %v1394_v59 = vadd.f32 %v2915_v48, %v1326_v34 }
 0x128   :  { %1473 = vst.msk [vmem:[%s3348_s6 + $0x128] sm:$0xff] %vm87_vm0, %v1409_v7  ;;  %v1211_v63 = vpop.f32.mrf.mxu3 }
 0x129   :  { %v1357_v15 = vadd.f32 %v3055_v36, %v1211_v63  ;;  %1442 = vst.msk [vmem:[%s3348_s6 + $0x30] sm:$0xff] %vm87_vm0, %v1378_v29 }
 0x12a   :  { %1458 = vst.msk [vmem:[%s3348_s6 + $0xb0] sm:$0xff] %vm87_vm0, %v1394_v59 }
 0x12b   :  { %v1166_v49 = vpop.f32.mrf.mxu2  ;;  %v1425_v58 = vadd.f32 %v2915_v48, %v1357_v15 }
 0x12c   :  { %v1342_v51 = vadd.f32 %v3082_v57, %v1166_v49  ;;  %v1073_v56 = vpop.f32.mrf.mxu0  ;;  %v1121_v6 = vpop.f32.mrf.mxu1 }
 0x12d   :  { %1489 = vst.msk [vmem:[%s3348_s6 + $0x1a8] sm:$0xff] %vm87_vm0, %v1425_v58  ;;  %v1311_v35 = vadd.f32 %v3109_v13, %v1073_v56  ;;  %v1327_v17 = vadd.f32 %v3109_v13, %v1121_v6 }
 0x12e   :  { %v1410_v4 = vadd.f32 %v2915_v48, %v1342_v51 }
 0x12f   :  { %v1379_v12 = vadd.f32 %v2915_v48, %v1311_v35  ;;  %v1395_v38 = vadd.f32 %v2915_v48, %v1327_v17 }
 0x130   :  { %1474 = vst.msk [vmem:[%s3348_s6 + $0x130] sm:$0xff] %vm87_vm0, %v1410_v4  ;;  %v1214_v32 = vpop.f32.mrf.mxu3 }
 0x131   :  { %v1358_v20 = vadd.f32 %v3082_v57, %v1214_v32  ;;  %1443 = vst.msk [vmem:[%s3348_s6 + $0x38] sm:$0xff] %vm87_vm0, %v1379_v12 }
 0x132   :  { %1459 = vst.msk [vmem:[%s3348_s6 + $0xb8] sm:$0xff] %vm87_vm0, %v1395_v38 }
 0x133   :  { %v1169_v3 = vpop.f32.mrf.mxu2  ;;  %v1426_v27 = vadd.f32 %v2915_v48, %v1358_v20 }
 0x134   :  { %v1343_v23 = vadd.f32 %v3109_v13, %v1169_v3  ;;  %v1076_v45 = vpop.f32.mrf.mxu0  ;;  %v1124_v10 = vpop.f32.mrf.mxu1 }
 0x135   :  { %1490 = vst.msk [vmem:[%s3348_s6 + $0x1b0] sm:$0xff] %vm87_vm0, %v1426_v27  ;;  %v1312_v39 = vadd.f32 %v2908_v42, %v1076_v45  ;;  %v1328_v19 = vadd.f32 %v2908_v42, %v1124_v10 }
 0x136   :  { %v1411_v53 = vadd.f32 %v2915_v48, %v1343_v23 }
 0x137   :  { %v1380_v60 = vadd.f32 %v2915_v48, %v1312_v39  ;;  %v1396_v43 = vadd.f32 %v2915_v48, %v1328_v19 }
 0x138   :  { %1475 = vst.msk [vmem:[%s3348_s6 + $0x138] sm:$0xff] %vm87_vm0, %v1411_v53  ;;  %v1217_v52 = vpop.f32.mrf.mxu3 }
 0x139   :  { %v1359_v9 = vadd.f32 %v3109_v13, %v1217_v52  ;;  %1444 = vst.msk [vmem:[%s3348_s6 + $0x40] sm:$0xff] %vm87_vm0, %v1380_v60 }
 0x13a   :  { %1460 = vst.msk [vmem:[%s3348_s6 + $0xc0] sm:$0xff] %vm87_vm0, %v1396_v43 }
 0x13b   :  { %v1427_v14 = vadd.f32 %v2915_v48, %v1359_v9 }
 0x13c   :  { %v1079_v47 = vpop.f32.mrf.mxu0  ;;  %v1127_v24 = vpop.f32.mrf.mxu1 }
 0x13d   :  { %1491 = vst.msk [vmem:[%s3348_s6 + $0x1b8] sm:$0xff] %vm87_vm0, %v1427_v14  ;;  %v1313_v8 = vadd.f32 %v2937_v54, %v1079_v47  ;;  %v1329_v22 = vadd.f32 %v2937_v54, %v1127_v24 }
 0x13f   :  { %v1381_v16 = vadd.f32 %v2915_v48, %v1313_v8  ;;  %v1397_v1 = vadd.f32 %v2915_v48, %v1329_v22 }
 0x141   :  { %1445 = vst.msk [vmem:[%s3348_s6 + $0x48] sm:$0xff] %vm87_vm0, %v1381_v16 }
 0x142   :  { %1461 = vst.msk [vmem:[%s3348_s6 + $0xc8] sm:$0xff] %vm87_vm0, %v1397_v1 }
 0x144   :  { %v1082_v26 = vpop.f32.mrf.mxu0  ;;  %v1130_v40 = vpop.f32.mrf.mxu1 }
 0x145   :  { %v1314_v50 = vadd.f32 %v2965_v2, %v1082_v26  ;;  %v1330_v5 = vadd.f32 %v2965_v2, %v1130_v40 }
 0x147   :  { %v1172_v25 = vpop.f32.mrf.mxu2  ;;  %v1382_v41 = vadd.f32 %v2915_v48, %v1314_v50  ;;  %v1398_v28 = vadd.f32 %v2915_v48, %v1330_v5 }
 0x148   :  { %v1344_v0 = vadd.f32 %v2908_v42, %v1172_v25 }
 0x149   :  { %1446 = vst.msk [vmem:[%s3348_s6 + $0x50] sm:$0xff] %vm87_vm0, %v1382_v41 }
 0x14a   :  { %v1412_v61 = vadd.f32 %v2915_v48, %v1344_v0  ;;  %1462 = vst.msk [vmem:[%s3348_s6 + $0xd0] sm:$0xff] %vm87_vm0, %v1398_v28 }
 0x14c   :  { %1476 = vst.msk [vmem:[%s3348_s6 + $0x140] sm:$0xff] %vm87_vm0, %v1412_v61  ;;  %v1085_v11 = vpop.f32.mrf.mxu0  ;;  %v1133_v18 = vpop.f32.mrf.mxu1 }
 0x14d   :  { %v1315_v7 = vadd.f32 %v2996_v55, %v1085_v11  ;;  %v1331_v44 = vadd.f32 %v2996_v55, %v1133_v18 }
 0x14f   :  { %v1175_v46 = vpop.f32.mrf.mxu2  ;;  %v1383_v34 = vadd.f32 %v2915_v48, %v1315_v7  ;;  %v1399_v63 = vadd.f32 %v2915_v48, %v1331_v44 }
 0x150   :  { %v1345_v21 = vadd.f32 %v2937_v54, %v1175_v46 }
 0x151   :  { %1447 = vst.msk [vmem:[%s3348_s6 + $0x58] sm:$0xff] %vm87_vm0, %v1383_v34 }
 0x152   :  { %v1413_v30 = vadd.f32 %v2915_v48, %v1345_v21  ;;  %1463 = vst.msk [vmem:[%s3348_s6 + $0xd8] sm:$0xff] %vm87_vm0, %v1399_v63 }
 0x154   :  { %1477 = vst.msk [vmem:[%s3348_s6 + $0x148] sm:$0xff] %vm87_vm0, %v1413_v30  ;;  %v1088_v59 = vpop.f32.mrf.mxu0  ;;  %v1136_v37 = vpop.f32.mrf.mxu1 }
 0x155   :  { %v1316_v15 = vadd.f32 %v3027_v33, %v1088_v59  ;;  %v1332_v49 = vadd.f32 %v3027_v33, %v1136_v37 }
 0x157   :  { %v1178_v31 = vpop.f32.mrf.mxu2  ;;  %v1384_v56 = vadd.f32 %v2915_v48, %v1316_v15  ;;  %v1400_v6 = vadd.f32 %v2915_v48, %v1332_v49 }
 0x158   :  { %v1346_v62 = vadd.f32 %v2965_v2, %v1178_v31 }
 0x159   :  { %1448 = vst.msk [vmem:[%s3348_s6 + $0x60] sm:$0xff] %vm87_vm0, %v1384_v56 }
 0x15a   :  { %v1414_v29 = vadd.f32 %v2915_v48, %v1346_v62  ;;  %1464 = vst.msk [vmem:[%s3348_s6 + $0xe0] sm:$0xff] %vm87_vm0, %v1400_v6 }
 0x15c   :  { %1478 = vst.msk [vmem:[%s3348_s6 + $0x150] sm:$0xff] %vm87_vm0, %v1414_v29  ;;  %v1220_v58 = vpop.f32.mrf.mxu3  ;;  %v1139_v12 = vpop.f32.mrf.mxu1 }
 0x15d   :  { %v1360_v35 = vadd.f32 %v2908_v42, %v1220_v58  ;;  %v1091_v42 = vpop.f32.mrf.mxu0  ;;  %v1333_v20 = vadd.f32 %v3055_v36, %v1139_v12 }
 0x15e   :  { %v1317_v38 = vadd.f32 %v3055_v36, %v1091_v42 }
 0x15f   :  { %v1181_v51 = vpop.f32.mrf.mxu2  ;;  %v1428_v32 = vadd.f32 %v2915_v48, %v1360_v35  ;;  %v1401_v45 = vadd.f32 %v2915_v48, %v1333_v20 }
 0x160   :  { %v1347_v4 = vadd.f32 %v2996_v55, %v1181_v51  ;;  %v1385_v53 = vadd.f32 %v2915_v48, %v1317_v38 }
 0x161   :  { %1492 = vst.msk [vmem:[%s3348_s6 + $0x1c0] sm:$0xff] %vm87_vm0, %v1428_v32 }
 0x162   :  { %v1415_v17 = vadd.f32 %v2915_v48, %v1347_v4  ;;  %1449 = vst.msk [vmem:[%s3348_s6 + $0x68] sm:$0xff] %vm87_vm0, %v1385_v53 }
 0x163   :  { %1465 = vst.msk [vmem:[%s3348_s6 + $0xe8] sm:$0xff] %vm87_vm0, %v1401_v45 }
 0x164   :  { %1479 = vst.msk [vmem:[%s3348_s6 + $0x158] sm:$0xff] %vm87_vm0, %v1415_v17  ;;  %v1223_v23 = vpop.f32.mrf.mxu3  ;;  %v1142_v52 = vpop.f32.mrf.mxu1 }
 0x165   :  { %v1361_v10 = vadd.f32 %v2937_v54, %v1223_v23  ;;  %v1094_v54 = vpop.f32.mrf.mxu0  ;;  %v1334_v43 = vadd.f32 %v3082_v57, %v1142_v52 }
 0x166   :  { %v1318_v60 = vadd.f32 %v3082_v57, %v1094_v54 }
 0x167   :  { %v1184_v3 = vpop.f32.mrf.mxu2  ;;  %v1429_v19 = vadd.f32 %v2915_v48, %v1361_v10  ;;  %v1402_v8 = vadd.f32 %v2915_v48, %v1334_v43 }
 0x168   :  { %v1348_v27 = vadd.f32 %v3027_v33, %v1184_v3  ;;  %v1386_v24 = vadd.f32 %v2915_v48, %v1318_v60 }
 0x169   :  { %1493 = vst.msk [vmem:[%s3348_s6 + $0x1c8] sm:$0xff] %vm87_vm0, %v1429_v19 }
 0x16a   :  { %v1416_v39 = vadd.f32 %v2915_v48, %v1348_v27  ;;  %1450 = vst.msk [vmem:[%s3348_s6 + $0x70] sm:$0xff] %vm87_vm0, %v1386_v24 }
 0x16b   :  { %1466 = vst.msk [vmem:[%s3348_s6 + $0xf0] sm:$0xff] %vm87_vm0, %v1402_v8 }
 0x16c   :  { %1480 = vst.msk [vmem:[%s3348_s6 + $0x160] sm:$0xff] %vm87_vm0, %v1416_v39  ;;  %v1226_v14 = vpop.f32.mrf.mxu3  ;;  %v1145_v16 = vpop.f32.mrf.mxu1 }
 0x16d   :  { %v1362_v22 = vadd.f32 %v2965_v2, %v1226_v14  ;;  %v1097_v2 = vpop.f32.mrf.mxu0  ;;  %v1335_v61 = vadd.f32 %v3109_v13, %v1145_v16 }
 0x16e   :  { %v1319_v1 = vadd.f32 %v3109_v13, %v1097_v2 }
 0x16f   :  { %v1187_v9 = vpop.f32.mrf.mxu2  ;;  %v1430_v0 = vadd.f32 %v2915_v48, %v1362_v22  ;;  %v1403_v46 = vadd.f32 %v2915_v48, %v1335_v61 }
 0x170   :  { %v1349_v47 = vadd.f32 %v3055_v36, %v1187_v9  ;;  %v1387_v5 = vadd.f32 %v2915_v48, %v1319_v1 }
 0x171   :  { %1494 = vst.msk [vmem:[%s3348_s6 + $0x1d0] sm:$0xff] %vm87_vm0, %v1430_v0 }
 0x172   :  { %v1417_v25 = vadd.f32 %v2915_v48, %v1349_v47  ;;  %1451 = vst.msk [vmem:[%s3348_s6 + $0x78] sm:$0xff] %vm87_vm0, %v1387_v5 }
 0x173   :  { %1467 = vst.msk [vmem:[%s3348_s6 + $0xf8] sm:$0xff] %vm87_vm0, %v1403_v46 }
 0x174   :  { %1481 = vst.msk [vmem:[%s3348_s6 + $0x168] sm:$0xff] %vm87_vm0, %v1417_v25  ;;  %v1229_v40 = vpop.f32.mrf.mxu3 }
 0x175   :  { %v1363_v21 = vadd.f32 %v2996_v55, %v1229_v40 }
 0x177   :  { %v1190_v26 = vpop.f32.mrf.mxu2  ;;  %v1431_v28 = vadd.f32 %v2915_v48, %v1363_v21 }
 0x178   :  { %v1350_v50 = vadd.f32 %v3082_v57, %v1190_v26 }
 0x179   :  { %1495 = vst.msk [vmem:[%s3348_s6 + $0x1d8] sm:$0xff] %vm87_vm0, %v1431_v28 }
 0x17a   :  { %v1418_v41 = vadd.f32 %v2915_v48, %v1350_v50 }
 0x17c   :  { %1482 = vst.msk [vmem:[%s3348_s6 + $0x170] sm:$0xff] %vm87_vm0, %v1418_v41  ;;  %v1232_v30 = vpop.f32.mrf.mxu3 }
 0x17d   :  { %v1364_v18 = vadd.f32 %v3027_v33, %v1232_v30 }
 0x17f   :  { %v1193_v55 = vpop.f32.mrf.mxu2  ;;  %v1432_v44 = vadd.f32 %v2915_v48, %v1364_v18 }
 0x180   :  { %v1351_v11 = vadd.f32 %v3109_v13, %v1193_v55 }
 0x181   :  { %1496 = vst.msk [vmem:[%s3348_s6 + $0x1e0] sm:$0xff] %vm87_vm0, %v1432_v44 }
 0x182   :  { %v1419_v7 = vadd.f32 %v2915_v48, %v1351_v11 }
 0x184   :  { %1483 = vst.msk [vmem:[%s3348_s6 + $0x178] sm:$0xff] %vm87_vm0, %v1419_v7  ;;  %v1235_v31 = vpop.f32.mrf.mxu3 }
 0x185   :  { %v1365_v62 = vadd.f32 %v3055_v36, %v1235_v31 }
 0x187   :  { %v1433_v34 = vadd.f32 %v2915_v48, %v1365_v62 }
 0x189   :  { %1497 = vst.msk [vmem:[%s3348_s6 + $0x1e8] sm:$0xff] %vm87_vm0, %v1433_v34 }
 0x18c   :  { %v1238_v33 = vpop.f32.mrf.mxu3 }
 0x18d   :  { %v1366_v63 = vadd.f32 %v3082_v57, %v1238_v33 }
 0x18f   :  { %v1434_v29 = vadd.f32 %v2915_v48, %v1366_v63 }
 0x191   :  { %1498 = vst.msk [vmem:[%s3348_s6 + $0x1f0] sm:$0xff] %vm87_vm0, %v1434_v29 }
 0x194   :  { %v1241_v59 = vpop.f32.mrf.mxu3 }
 0x195   :  { %v1367_v36 = vadd.f32 %v3109_v13, %v1241_v59 }
 0x197   :  { %v1435_v37 = vadd.f32 %v2915_v48, %v1367_v36 }
 0x199   :  { %1499 = vst.msk [vmem:[%s3348_s6 + $0x1f8] sm:$0xff] %vm87_vm0, %v1435_v37 }

</bundles_post_ra>
